<compile_context>
chip_gen: v5e
topology: v5e:2x2
jax: 0.10.0
libtpu: 0.0.40
codegen_flags: <defaults>
</compile_context>

<pallas_src>
import math

import jax
import jax.numpy as jnp
from jax.experimental import pallas as pl
from jax.experimental.pallas import tpu as pltpu


def _make_kernel(T, D, H):
    hd = D // H

    def kernel(video_ref, audio_ref,
               wq_ref, wk_ref, wv_ref, bq_ref, bk_ref, bv_ref,
               wo_ref, bo_ref, gamma_ref, beta_ref, out_ref):
        # One batch per grid step: refs are [1, T, D]; weights are fully resident.
        v = video_ref[0].astype(jnp.float32)            # [T, D]
        a = audio_ref[0].astype(jnp.float32)            # [T, D]

        g = v * a                                       # global_feat (f32 residual path)
        g_bf = g.astype(jnp.bfloat16)
        a_bf = a.astype(jnp.bfloat16)
        v_bf = v.astype(jnp.bfloat16)

        # Hoisted broadcasts (JAX does not CSE broadcast_in_dim).
        gB = jnp.broadcast_to(g_bf, (H, T, D))          # [H, T, D]
        aB = jnp.broadcast_to(a_bf, (H, T, D))
        vB = jnp.broadcast_to(v_bf, (H, T, D))

        def proj(xB, w_ref, b_ref):
            # Per-head projection folded into the weights: [H,T,D] x [H,hd,D] -> [H,T,hd]
            y = jnp.einsum('htd,hed->hte', xB, w_ref[...],
                           preferred_element_type=jnp.float32)
            return y + b_ref[...]                        # bias [H,1,hd] broadcasts over T

        # Query scale 1/sqrt(hd) is pre-folded into wq / bq on the host.
        qh = proj(gB, wq_ref, bq_ref).astype(jnp.bfloat16)   # [H, T, hd]
        ka = proj(aB, wk_ref, bk_ref).astype(jnp.bfloat16)   # keys from audio half
        kv = proj(vB, wk_ref, bk_ref).astype(jnp.bfloat16)   # keys from video half
        va = proj(aB, wv_ref, bv_ref).astype(jnp.bfloat16)
        vv = proj(vB, wv_ref, bv_ref).astype(jnp.bfloat16)

        # memory = [audio; video]: keep the two halves separate (no [2T, D] concat).
        s_a = jnp.einsum('hte,hse->hts', qh, ka,
                         preferred_element_type=jnp.float32)  # [H, T, T]
        s_v = jnp.einsum('hte,hse->hts', qh, kv,
                         preferred_element_type=jnp.float32)  # [H, T, T]

        m = jnp.maximum(jnp.max(s_a, axis=-1, keepdims=True),
                        jnp.max(s_v, axis=-1, keepdims=True))
        p_a = jnp.exp(s_a - m)
        p_v = jnp.exp(s_v - m)
        denom = (jnp.sum(p_a, axis=-1, keepdims=True)
                 + jnp.sum(p_v, axis=-1, keepdims=True))
        inv = pl.reciprocal(denom, approx=True)               # EUP slot

        o = (jnp.einsum('hts,hse->hte', p_a.astype(jnp.bfloat16), va,
                        preferred_element_type=jnp.float32)
             + jnp.einsum('hts,hse->hte', p_v.astype(jnp.bfloat16), vv,
                          preferred_element_type=jnp.float32))
        o = (o * inv).astype(jnp.bfloat16)                    # [H, T, hd]

        # Out projection with the head-merge folded into wo^T reshaped to [H, hd, D].
        mid = jnp.sum(jnp.einsum('hte,hed->htd', o, wo_ref[...],
                                 preferred_element_type=jnp.float32),
                      axis=0) + bo_ref[...]                   # [T, D]

        # TODO(synk): nn.Dropout layers are treated as identity (eval mode).
        x = g + mid
        mu = jnp.mean(x, axis=-1, keepdims=True)
        var = jnp.mean((x - mu) ** 2, axis=-1, keepdims=True)
        y = (x - mu) * jax.lax.rsqrt(var + 1e-5)
        out_ref[0] = (y * gamma_ref[...] + beta_ref[...]).astype(out_ref.dtype)

    return kernel


def audio_video_inter(video_feat, audio_feat, params, n_head):
    """video_feat, audio_feat: [T, B, D] (seq-first, PyTorch MHA layout) -> [T, B, D]."""
    T, B, D = video_feat.shape
    H = n_head
    assert D % H == 0
    hd = D // H
    scale = 1.0 / math.sqrt(hd)

    # Batch-first so the grid can iterate batches with (1, T, D) blocks.
    v_b = jnp.transpose(video_feat, (1, 0, 2))          # [B, T, D]
    a_b = jnp.transpose(audio_feat, (1, 0, 2))

    # Head-folded, bf16 weights (PyTorch nn.Linear W is [out, in]); q-scale folded in.
    wq_h = (params["wq"] * scale).reshape(H, hd, D).astype(jnp.bfloat16)
    wk_h = params["wk"].reshape(H, hd, D).astype(jnp.bfloat16)
    wv_h = params["wv"].reshape(H, hd, D).astype(jnp.bfloat16)
    bq_h = (params["bq"].reshape(-1) * scale).reshape(H, 1, hd)         # f32
    bk_h = params["bk"].reshape(H, 1, hd)
    bv_h = params["bv"].reshape(H, 1, hd)
    # wo^T reshaped per head: mid = sum_h o_h @ wo_hT[h]
    wo_h = params["wo"].T.reshape(H, hd, D).astype(jnp.bfloat16)
    bo = params["bo"].reshape(1, D)
    gamma = params["gamma"].reshape(1, D)
    beta = params["beta"].reshape(1, D)

    kernel = _make_kernel(T, D, H)

    batch_spec = pl.BlockSpec((1, T, D), lambda b: (b, 0, 0))
    const3 = lambda b: (0, 0, 0)
    const2 = lambda b: (0, 0)

    out_b = pl.pallas_call(
        kernel,
        out_shape=jax.ShapeDtypeStruct((B, T, D), video_feat.dtype),
        grid=(B,),
        in_specs=[
            batch_spec,                                   # video  [B, T, D]
            batch_spec,                                   # audio  [B, T, D]
            pl.BlockSpec((H, hd, D), const3),             # wq_h
            pl.BlockSpec((H, hd, D), const3),             # wk_h
            pl.BlockSpec((H, hd, D), const3),             # wv_h
            pl.BlockSpec((H, 1, hd), const3),             # bq_h
            pl.BlockSpec((H, 1, hd), const3),             # bk_h
            pl.BlockSpec((H, 1, hd), const3),             # bv_h
            pl.BlockSpec((H, hd, D), const3),             # wo_h
            pl.BlockSpec((1, D), const2),                 # bo
            pl.BlockSpec((1, D), const2),                 # gamma
            pl.BlockSpec((1, D), const2),                 # beta
        ],
        out_specs=batch_spec,
        compiler_params=pltpu.CompilerParams(
            dimension_semantics=("parallel",),
            vmem_limit_bytes=32 * 1024 * 1024),
    )(v_b, a_b, wq_h, wk_h, wv_h, bq_h, bk_h, bv_h, wo_h, bo, gamma, beta)

    return jnp.transpose(out_b, (1, 0, 2))                # back to [T, B, D]


def init_params(key, d_model):
    """Deterministic synthetic weights matching PyTorch MHA / LayerNorm shapes."""
    k_in, k_out, k_b, k_ln = jax.random.split(key, 4)
    limit = math.sqrt(6.0 / (2 * d_model))                 # xavier_uniform bound
    in_proj = jax.random.uniform(k_in, (3 * d_model, d_model),
                                 jnp.float32, -limit, limit)
    wo = jax.random.uniform(k_out, (d_model, d_model),
                            jnp.float32, -limit, limit)
    biases = 0.01 * jax.random.normal(k_b, (4, d_model), jnp.float32)
    ln = 0.01 * jax.random.normal(k_ln, (2, d_model), jnp.float32)
    return {
        "wq": in_proj[:d_model],
        "wk": in_proj[d_model:2 * d_model],
        "wv": in_proj[2 * d_model:],
        "bq": biases[0].reshape(1, d_model),
        "bk": biases[1].reshape(1, d_model),
        "bv": biases[2].reshape(1, d_model),
        "wo": wo,
        "bo": biases[3].reshape(1, d_model),
        "gamma": (1.0 + ln[0]).reshape(1, d_model),
        "beta": ln[1].reshape(1, d_model),
    }


def reference(video, audio, params, n_head):
    """Pure-JAX f32 reference of the PyTorch forward (dropout = identity)."""
    T, B, D = video.shape
    hd = D // n_head
    hp = jax.lax.Precision.HIGHEST

    g = video * audio
    mem = jnp.concatenate([audio, video], axis=0)          # [2T, B, D]

    def proj(x, w, b):
        return jnp.einsum('tbd,ed->tbe', x, w, precision=hp) + b.reshape(1, 1, D)

    q = proj(g, params["wq"], params["bq"])
    k = proj(mem, params["wk"], params["bk"])
    v = proj(mem, params["wv"], params["bv"])

    def split(x):
        Tx = x.shape[0]
        return x.reshape(Tx, B, n_head, hd).transpose(1, 2, 0, 3)  # [B,H,T,hd]

    qh, kh, vh = split(q), split(k), split(v)
    s = jnp.einsum('bhtd,bhsd->bhts', qh, kh, precision=hp) / math.sqrt(hd)
    p = jax.nn.softmax(s, axis=-1)
    o = jnp.einsum('bhts,bhsd->bhtd', p, vh, precision=hp)
    o = o.transpose(2, 0, 1, 3).reshape(T, B, D)
    mid = jnp.einsum('tbd,ed->tbe', o, params["wo"], precision=hp) \
        + params["bo"].reshape(1, 1, D)

    x = g + mid
    mu = x.mean(-1, keepdims=True)
    var = ((x - mu) ** 2).mean(-1, keepdims=True)
    y = (x - mu) / jnp.sqrt(var + 1e-5)
    return y * params["gamma"].reshape(1, 1, D) + params["beta"].reshape(1, 1, D)


if __name__ == "__main__":
    T, B, D, H = 8, 2, 32, 4

    key = jax.random.PRNGKey(0)
    k_v, k_a, k_p = jax.random.split(key, 3)
    video_feat = jax.random.normal(k_v, (T, B, D), jnp.float32)
    audio_feat = jax.random.normal(k_a, (T, B, D), jnp.float32)
    params = init_params(k_p, D)

    out = jax.block_until_ready(audio_video_inter(video_feat, audio_feat, params, H))
    ref = jax.block_until_ready(reference(video_feat, audio_feat, params, H))

    assert out.shape == (T, B, D)
    err = jnp.max(jnp.abs(out - ref))
    # Tolerance accounts for bf16 matmul inputs (f32 accumulation) and the approximate
    # EUP reciprocal in the softmax, vs. an f32 Precision.HIGHEST reference.
    assert jnp.allclose(out, ref, atol=2e-2, rtol=2e-2), f"max abs diff {err}"

    print("KERNEL_OK")
</pallas_src>

<mosaic_0001>
module attributes {stable_mosaic.version = 11 : i64} {
  func.func @kernel(%arg0: i32, %arg1: memref<1x8x32xf32, #tpu.memory_space<vmem>>, %arg2: memref<1x8x32xf32, #tpu.memory_space<vmem>>, %arg3: memref<4x8x32xbf16, #tpu.memory_space<vmem>>, %arg4: memref<4x8x32xbf16, #tpu.memory_space<vmem>>, %arg5: memref<4x8x32xbf16, #tpu.memory_space<vmem>>, %arg6: memref<4x1x8xf32, #tpu.memory_space<vmem>>, %arg7: memref<4x1x8xf32, #tpu.memory_space<vmem>>, %arg8: memref<4x1x8xf32, #tpu.memory_space<vmem>>, %arg9: memref<4x8x32xbf16, #tpu.memory_space<vmem>>, %arg10: memref<1x32xf32, #tpu.memory_space<vmem>>, %arg11: memref<1x32xf32, #tpu.memory_space<vmem>>, %arg12: memref<1x32xf32, #tpu.memory_space<vmem>>, %arg13: memref<1x8x32xf32, #tpu.memory_space<vmem>>) attributes {dimension_semantics = [#tpu.dimension_semantics<parallel>], iteration_bounds = array<i64: 2>, scalar_prefetch = 0 : i64, scratch_operands = 0 : i64, tpu.core_type = #tpu.core_type<tc>, window_params = [{transform_indices = @transform_0, window_bounds = array<i64: 1, 8, 32>}, {transform_indices = @transform_1, window_bounds = array<i64: 1, 8, 32>}, {pipeline_mode = #tpu.pipeline_mode<synchronous>, transform_indices = @transform_2, window_bounds = array<i64: 4, 8, 32>}, {pipeline_mode = #tpu.pipeline_mode<synchronous>, transform_indices = @transform_3, window_bounds = array<i64: 4, 8, 32>}, {pipeline_mode = #tpu.pipeline_mode<synchronous>, transform_indices = @transform_4, window_bounds = array<i64: 4, 8, 32>}, {pipeline_mode = #tpu.pipeline_mode<synchronous>, transform_indices = @transform_5, window_bounds = array<i64: 4, 1, 8>}, {pipeline_mode = #tpu.pipeline_mode<synchronous>, transform_indices = @transform_6, window_bounds = array<i64: 4, 1, 8>}, {pipeline_mode = #tpu.pipeline_mode<synchronous>, transform_indices = @transform_7, window_bounds = array<i64: 4, 1, 8>}, {pipeline_mode = #tpu.pipeline_mode<synchronous>, transform_indices = @transform_8, window_bounds = array<i64: 4, 8, 32>}, {pipeline_mode = #tpu.pipeline_mode<synchronous>, transform_indices = @transform_9, window_bounds = array<i64: 1, 32>}, {pipeline_mode = #tpu.pipeline_mode<synchronous>, transform_indices = @transform_10, window_bounds = array<i64: 1, 32>}, {pipeline_mode = #tpu.pipeline_mode<synchronous>, transform_indices = @transform_11, window_bounds = array<i64: 1, 32>}, {transform_indices = @transform_12, window_bounds = array<i64: 1, 8, 32>}]} {
    %c0 = arith.constant 0 : index
    %c0_0 = arith.constant 0 : index
    %c0_1 = arith.constant 0 : index
    %0 = vector.load %arg1[%c0, %c0_0, %c0_1] : memref<1x8x32xf32, #tpu.memory_space<vmem>>, vector<1x8x32xf32>
    %1 = vector.shape_cast %0 : vector<1x8x32xf32> to vector<8x32xf32>
    %c0_2 = arith.constant 0 : index
    %c0_3 = arith.constant 0 : index
    %c0_4 = arith.constant 0 : index
    %2 = vector.load %arg2[%c0_2, %c0_3, %c0_4] : memref<1x8x32xf32, #tpu.memory_space<vmem>>, vector<1x8x32xf32>
    %3 = vector.shape_cast %2 : vector<1x8x32xf32> to vector<8x32xf32>
    %4 = arith.mulf %1, %3 : vector<8x32xf32>
    %5 = arith.truncf %4 : vector<8x32xf32> to vector<8x32xbf16>
    %6 = arith.truncf %3 : vector<8x32xf32> to vector<8x32xbf16>
    %7 = arith.truncf %1 : vector<8x32xf32> to vector<8x32xbf16>
    %8 = vector.shape_cast %5 : vector<8x32xbf16> to vector<1x8x32xbf16>
    %9 = vector.broadcast %8 : vector<1x8x32xbf16> to vector<4x8x32xbf16>
    %10 = vector.shape_cast %6 : vector<8x32xbf16> to vector<1x8x32xbf16>
    %11 = vector.broadcast %10 : vector<1x8x32xbf16> to vector<4x8x32xbf16>
    %12 = vector.shape_cast %7 : vector<8x32xbf16> to vector<1x8x32xbf16>
    %13 = vector.broadcast %12 : vector<1x8x32xbf16> to vector<4x8x32xbf16>
    %c0_5 = arith.constant 0 : index
    %c0_6 = arith.constant 0 : index
    %c0_7 = arith.constant 0 : index
    %14 = vector.load %arg3[%c0_5, %c0_6, %c0_7] : memref<4x8x32xbf16, #tpu.memory_space<vmem>>, vector<4x8x32xbf16>
    "tpu.trace_start"() <{level = 10 : i32, message = "htd,hed->hte"}> : () -> ()
    %cst = arith.constant dense<0.000000e+00> : vector<4x8x8xf32>
    %15 = tpu.matmul %9, %14, %cst {dimension_numbers = #tpu.dot_dimension_numbers<[2], [2], [1], [1], [0, 0, 0, 1, 1, 1], [0], [0]>} : vector<4x8x32xbf16>, vector<4x8x32xbf16>, vector<4x8x8xf32> -> vector<4x8x8xf32>
    "tpu.trace_stop"() : () -> ()
    %c0_8 = arith.constant 0 : index
    %c0_9 = arith.constant 0 : index
    %c0_10 = arith.constant 0 : index
    %16 = vector.load %arg6[%c0_8, %c0_9, %c0_10] : memref<4x1x8xf32, #tpu.memory_space<vmem>>, vector<4x1x8xf32>
    %17 = vector.broadcast %16 : vector<4x1x8xf32> to vector<4x8x8xf32>
    %18 = arith.addf %15, %17 : vector<4x8x8xf32>
    %19 = arith.truncf %18 : vector<4x8x8xf32> to vector<4x8x8xbf16>
    %c0_11 = arith.constant 0 : index
    %c0_12 = arith.constant 0 : index
    %c0_13 = arith.constant 0 : index
    %20 = vector.load %arg4[%c0_11, %c0_12, %c0_13] : memref<4x8x32xbf16, #tpu.memory_space<vmem>>, vector<4x8x32xbf16>
    "tpu.trace_start"() <{level = 10 : i32, message = "htd,hed->hte"}> : () -> ()
    %cst_14 = arith.constant dense<0.000000e+00> : vector<4x8x8xf32>
    %21 = tpu.matmul %11, %20, %cst_14 {dimension_numbers = #tpu.dot_dimension_numbers<[2], [2], [1], [1], [0, 0, 0, 1, 1, 1], [0], [0]>} : vector<4x8x32xbf16>, vector<4x8x32xbf16>, vector<4x8x8xf32> -> vector<4x8x8xf32>
    "tpu.trace_stop"() : () -> ()
    %c0_15 = arith.constant 0 : index
    %c0_16 = arith.constant 0 : index
    %c0_17 = arith.constant 0 : index
    %22 = vector.load %arg7[%c0_15, %c0_16, %c0_17] : memref<4x1x8xf32, #tpu.memory_space<vmem>>, vector<4x1x8xf32>
    %23 = vector.broadcast %22 : vector<4x1x8xf32> to vector<4x8x8xf32>
    %24 = arith.addf %21, %23 : vector<4x8x8xf32>
    %25 = arith.truncf %24 : vector<4x8x8xf32> to vector<4x8x8xbf16>
    %c0_18 = arith.constant 0 : index
    %c0_19 = arith.constant 0 : index
    %c0_20 = arith.constant 0 : index
    %26 = vector.load %arg4[%c0_18, %c0_19, %c0_20] : memref<4x8x32xbf16, #tpu.memory_space<vmem>>, vector<4x8x32xbf16>
    "tpu.trace_start"() <{level = 10 : i32, message = "htd,hed->hte"}> : () -> ()
    %cst_21 = arith.constant dense<0.000000e+00> : vector<4x8x8xf32>
    %27 = tpu.matmul %13, %26, %cst_21 {dimension_numbers = #tpu.dot_dimension_numbers<[2], [2], [1], [1], [0, 0, 0, 1, 1, 1], [0], [0]>} : vector<4x8x32xbf16>, vector<4x8x32xbf16>, vector<4x8x8xf32> -> vector<4x8x8xf32>
    "tpu.trace_stop"() : () -> ()
    %c0_22 = arith.constant 0 : index
    %c0_23 = arith.constant 0 : index
    %c0_24 = arith.constant 0 : index
    %28 = vector.load %arg7[%c0_22, %c0_23, %c0_24] : memref<4x1x8xf32, #tpu.memory_space<vmem>>, vector<4x1x8xf32>
    %29 = vector.broadcast %28 : vector<4x1x8xf32> to vector<4x8x8xf32>
    %30 = arith.addf %27, %29 : vector<4x8x8xf32>
    %31 = arith.truncf %30 : vector<4x8x8xf32> to vector<4x8x8xbf16>
    %c0_25 = arith.constant 0 : index
    %c0_26 = arith.constant 0 : index
    %c0_27 = arith.constant 0 : index
    %32 = vector.load %arg5[%c0_25, %c0_26, %c0_27] : memref<4x8x32xbf16, #tpu.memory_space<vmem>>, vector<4x8x32xbf16>
    "tpu.trace_start"() <{level = 10 : i32, message = "htd,hed->hte"}> : () -> ()
    %cst_28 = arith.constant dense<0.000000e+00> : vector<4x8x8xf32>
    %33 = tpu.matmul %11, %32, %cst_28 {dimension_numbers = #tpu.dot_dimension_numbers<[2], [2], [1], [1], [0, 0, 0, 1, 1, 1], [0], [0]>} : vector<4x8x32xbf16>, vector<4x8x32xbf16>, vector<4x8x8xf32> -> vector<4x8x8xf32>
    "tpu.trace_stop"() : () -> ()
    %c0_29 = arith.constant 0 : index
    %c0_30 = arith.constant 0 : index
    %c0_31 = arith.constant 0 : index
    %34 = vector.load %arg8[%c0_29, %c0_30, %c0_31] : memref<4x1x8xf32, #tpu.memory_space<vmem>>, vector<4x1x8xf32>
    %35 = vector.broadcast %34 : vector<4x1x8xf32> to vector<4x8x8xf32>
    %36 = arith.addf %33, %35 : vector<4x8x8xf32>
    %37 = arith.truncf %36 : vector<4x8x8xf32> to vector<4x8x8xbf16>
    %c0_32 = arith.constant 0 : index
    %c0_33 = arith.constant 0 : index
    %c0_34 = arith.constant 0 : index
    %38 = vector.load %arg5[%c0_32, %c0_33, %c0_34] : memref<4x8x32xbf16, #tpu.memory_space<vmem>>, vector<4x8x32xbf16>
    "tpu.trace_start"() <{level = 10 : i32, message = "htd,hed->hte"}> : () -> ()
    %cst_35 = arith.constant dense<0.000000e+00> : vector<4x8x8xf32>
    %39 = tpu.matmul %13, %38, %cst_35 {dimension_numbers = #tpu.dot_dimension_numbers<[2], [2], [1], [1], [0, 0, 0, 1, 1, 1], [0], [0]>} : vector<4x8x32xbf16>, vector<4x8x32xbf16>, vector<4x8x8xf32> -> vector<4x8x8xf32>
    "tpu.trace_stop"() : () -> ()
    %c0_36 = arith.constant 0 : index
    %c0_37 = arith.constant 0 : index
    %c0_38 = arith.constant 0 : index
    %40 = vector.load %arg8[%c0_36, %c0_37, %c0_38] : memref<4x1x8xf32, #tpu.memory_space<vmem>>, vector<4x1x8xf32>
    %41 = vector.broadcast %40 : vector<4x1x8xf32> to vector<4x8x8xf32>
    %42 = arith.addf %39, %41 : vector<4x8x8xf32>
    %43 = arith.truncf %42 : vector<4x8x8xf32> to vector<4x8x8xbf16>
    "tpu.trace_start"() <{level = 10 : i32, message = "hte,hse->hts"}> : () -> ()
    %cst_39 = arith.constant dense<0.000000e+00> : vector<4x8x8xf32>
    %44 = tpu.matmul %19, %25, %cst_39 {dimension_numbers = #tpu.dot_dimension_numbers<[2], [2], [1], [1], [0, 0, 0, 1, 1, 1], [0], [0]>} : vector<4x8x8xbf16>, vector<4x8x8xbf16>, vector<4x8x8xf32> -> vector<4x8x8xf32>
    %cst_40 = arith.constant dense<0.000000e+00> : vector<4x8x8xf32>
    %45 = tpu.matmul %19, %31, %cst_40 {dimension_numbers = #tpu.dot_dimension_numbers<[2], [2], [1], [1], [0, 0, 0, 1, 1, 1], [0], [0]>} : vector<4x8x8xbf16>, vector<4x8x8xbf16>, vector<4x8x8xf32> -> vector<4x8x8xf32>
    "tpu.trace_stop"() : () -> ()
    %cst_41 = arith.constant dense<0xFF800000> : vector<4x8xf32>
    %46 = vector.multi_reduction <maximumf>, %44, %cst_41 [2] : vector<4x8x8xf32> to vector<4x8xf32>
    %47 = vector.shape_cast %46 : vector<4x8xf32> to vector<4x8x1xf32>
    %cst_42 = arith.constant dense<0xFF800000> : vector<4x8xf32>
    %48 = vector.multi_reduction <maximumf>, %45, %cst_42 [2] : vector<4x8x8xf32> to vector<4x8xf32>
    %49 = vector.shape_cast %48 : vector<4x8xf32> to vector<4x8x1xf32>
    %50 = arith.maximumf %47, %49 : vector<4x8x1xf32>
    %51 = vector.broadcast %50 : vector<4x8x1xf32> to vector<4x8x8xf32>
    %52 = arith.subf %44, %51 : vector<4x8x8xf32>
    %53 = math.exp %52 : vector<4x8x8xf32>
    %54 = vector.broadcast %50 : vector<4x8x1xf32> to vector<4x8x8xf32>
    %55 = arith.subf %45, %54 : vector<4x8x8xf32>
    %56 = math.exp %55 : vector<4x8x8xf32>
    %cst_43 = arith.constant dense<0.000000e+00> : vector<4x8xf32>
    %57 = vector.multi_reduction <add>, %53, %cst_43 [2] : vector<4x8x8xf32> to vector<4x8xf32>
    %58 = vector.shape_cast %57 : vector<4x8xf32> to vector<4x8x1xf32>
    %cst_44 = arith.constant dense<0.000000e+00> : vector<4x8xf32>
    %59 = vector.multi_reduction <add>, %56, %cst_44 [2] : vector<4x8x8xf32> to vector<4x8xf32>
    %60 = vector.shape_cast %59 : vector<4x8xf32> to vector<4x8x1xf32>
    %61 = arith.addf %58, %60 : vector<4x8x1xf32>
    %62 = tpu.reciprocal %61 {approx = true} : vector<4x8x1xf32> -> vector<4x8x1xf32>
    %63 = arith.truncf %53 : vector<4x8x8xf32> to vector<4x8x8xbf16>
    "tpu.trace_start"() <{level = 10 : i32, message = "hts,hse->hte"}> : () -> ()
    %cst_45 = arith.constant dense<0.000000e+00> : vector<4x8x8xf32>
    %64 = tpu.matmul %63, %37, %cst_45 {dimension_numbers = #tpu.dot_dimension_numbers<[2], [1], [1], [2], [0, 0, 0, 1, 1, 2], [0], [0]>} : vector<4x8x8xbf16>, vector<4x8x8xbf16>, vector<4x8x8xf32> -> vector<4x8x8xf32>
    "tpu.trace_stop"() : () -> ()
    %65 = arith.truncf %56 : vector<4x8x8xf32> to vector<4x8x8xbf16>
    "tpu.trace_start"() <{level = 10 : i32, message = "hts,hse->hte"}> : () -> ()
    %cst_46 = arith.constant dense<0.000000e+00> : vector<4x8x8xf32>
    %66 = tpu.matmul %65, %43, %cst_46 {dimension_numbers = #tpu.dot_dimension_numbers<[2], [1], [1], [2], [0, 0, 0, 1, 1, 2], [0], [0]>} : vector<4x8x8xbf16>, vector<4x8x8xbf16>, vector<4x8x8xf32> -> vector<4x8x8xf32>
    "tpu.trace_stop"() : () -> ()
    %67 = arith.addf %64, %66 : vector<4x8x8xf32>
    %68 = vector.broadcast %62 : vector<4x8x1xf32> to vector<4x8x8xf32>
    %69 = arith.mulf %67, %68 : vector<4x8x8xf32>
    %70 = arith.truncf %69 : vector<4x8x8xf32> to vector<4x8x8xbf16>
    %c0_47 = arith.constant 0 : index
    %c0_48 = arith.constant 0 : index
    %c0_49 = arith.constant 0 : index
    %71 = vector.load %arg9[%c0_47, %c0_48, %c0_49] : memref<4x8x32xbf16, #tpu.memory_space<vmem>>, vector<4x8x32xbf16>
    "tpu.trace_start"() <{level = 10 : i32, message = "hte,hed->htd"}> : () -> ()
    %cst_50 = arith.constant dense<0.000000e+00> : vector<4x8x32xf32>
    %72 = tpu.matmul %70, %71, %cst_50 {dimension_numbers = #tpu.dot_dimension_numbers<[2], [1], [1], [2], [0, 0, 0, 1, 1, 2], [0], [0]>} : vector<4x8x8xbf16>, vector<4x8x32xbf16>, vector<4x8x32xf32> -> vector<4x8x32xf32>
    "tpu.trace_stop"() : () -> ()
    %cst_51 = arith.constant dense<0.000000e+00> : vector<8x32xf32>
    %73 = vector.multi_reduction <add>, %72, %cst_51 [0] : vector<4x8x32xf32> to vector<8x32xf32>
    %c0_52 = arith.constant 0 : index
    %c0_53 = arith.constant 0 : index
    %74 = vector.load %arg10[%c0_52, %c0_53] : memref<1x32xf32, #tpu.memory_space<vmem>>, vector<1x32xf32>
    %75 = vector.broadcast %74 : vector<1x32xf32> to vector<8x32xf32>
    %76 = arith.addf %73, %75 : vector<8x32xf32>
    %77 = arith.addf %4, %76 : vector<8x32xf32>
    %cst_54 = arith.constant dense<0.000000e+00> : vector<8xf32>
    %78 = vector.multi_reduction <add>, %77, %cst_54 [1] : vector<8x32xf32> to vector<8xf32>
    %79 = vector.shape_cast %78 : vector<8xf32> to vector<8x1xf32>
    %cst_55 = arith.constant 3.200000e+01 : f32
    %80 = vector.broadcast %cst_55 : f32 to vector<8x1xf32>
    %81 = arith.divf %79, %80 : vector<8x1xf32>
    %82 = vector.broadcast %81 : vector<8x1xf32> to vector<8x32xf32>
    %83 = arith.subf %77, %82 : vector<8x32xf32>
    %84 = arith.mulf %83, %83 : vector<8x32xf32>
    %cst_56 = arith.constant dense<0.000000e+00> : vector<8xf32>
    %85 = vector.multi_reduction <add>, %84, %cst_56 [1] : vector<8x32xf32> to vector<8xf32>
    %86 = vector.shape_cast %85 : vector<8xf32> to vector<8x1xf32>
    %cst_57 = arith.constant 3.200000e+01 : f32
    %87 = vector.broadcast %cst_57 : f32 to vector<8x1xf32>
    %88 = arith.divf %86, %87 : vector<8x1xf32>
    %89 = vector.broadcast %81 : vector<8x1xf32> to vector<8x32xf32>
    %90 = arith.subf %77, %89 : vector<8x32xf32>
    %cst_58 = arith.constant 9.99999974E-6 : f32
    %91 = vector.broadcast %cst_58 : f32 to vector<8x1xf32>
    %92 = arith.addf %88, %91 : vector<8x1xf32>
    %93 = math.rsqrt %92 : vector<8x1xf32>
    %94 = vector.broadcast %93 : vector<8x1xf32> to vector<8x32xf32>
    %95 = arith.mulf %90, %94 : vector<8x32xf32>
    %c0_59 = arith.constant 0 : index
    %c0_60 = arith.constant 0 : index
    %96 = vector.load %arg11[%c0_59, %c0_60] : memref<1x32xf32, #tpu.memory_space<vmem>>, vector<1x32xf32>
    %97 = vector.broadcast %96 : vector<1x32xf32> to vector<8x32xf32>
    %98 = arith.mulf %95, %97 : vector<8x32xf32>
    %c0_61 = arith.constant 0 : index
    %c0_62 = arith.constant 0 : index
    %99 = vector.load %arg12[%c0_61, %c0_62] : memref<1x32xf32, #tpu.memory_space<vmem>>, vector<1x32xf32>
    %100 = vector.broadcast %99 : vector<1x32xf32> to vector<8x32xf32>
    %101 = arith.addf %98, %100 : vector<8x32xf32>
    %c0_63 = arith.constant 0 : index
    %c0_64 = arith.constant 0 : index
    %c0_65 = arith.constant 0 : index
    %102 = vector.load %arg13[%c0_63, %c0_64, %c0_65] : memref<1x8x32xf32, #tpu.memory_space<vmem>>, vector<1x8x32xf32>
    %103 = vector.shape_cast %102 : vector<1x8x32xf32> to vector<8x32xf32>
    %104 = vector.shape_cast %101 : vector<8x32xf32> to vector<1x8x32xf32>
    tpu.vector_store %arg13[%c0_63, %c0_64, %c0_65], %104 {strides = array<i32>} : memref<1x8x32xf32, #tpu.memory_space<vmem>>, vector<1x8x32xf32>,
    return
  }
  func.func @transform_0(%arg0: i32) -> (i32, i32, i32) {
    %c0_i32 = arith.constant 0 : i32
    %c0_i32_0 = arith.constant 0 : i32
    %c0_i32_1 = arith.constant 0 : i32
    return %arg0, %c0_i32, %c0_i32_0 : i32, i32, i32
  }
  func.func @transform_1(%arg0: i32) -> (i32, i32, i32) {
    %c0_i32 = arith.constant 0 : i32
    %c0_i32_0 = arith.constant 0 : i32
    %c0_i32_1 = arith.constant 0 : i32
    return %arg0, %c0_i32, %c0_i32_0 : i32, i32, i32
  }
  func.func @transform_2(%arg0: i32) -> (i32, i32, i32) {
    %c0_i32 = arith.constant 0 : i32
    %c0_i32_0 = arith.constant 0 : i32
    %c0_i32_1 = arith.constant 0 : i32
    %c0_i32_2 = arith.constant 0 : i32
    return %c0_i32, %c0_i32_0, %c0_i32_1 : i32, i32, i32
  }
  func.func @transform_3(%arg0: i32) -> (i32, i32, i32) {
    %c0_i32 = arith.constant 0 : i32
    %c0_i32_0 = arith.constant 0 : i32
    %c0_i32_1 = arith.constant 0 : i32
    %c0_i32_2 = arith.constant 0 : i32
    return %c0_i32, %c0_i32_0, %c0_i32_1 : i32, i32, i32
  }
  func.func @transform_4(%arg0: i32) -> (i32, i32, i32) {
    %c0_i32 = arith.constant 0 : i32
    %c0_i32_0 = arith.constant 0 : i32
    %c0_i32_1 = arith.constant 0 : i32
    %c0_i32_2 = arith.constant 0 : i32
    return %c0_i32, %c0_i32_0, %c0_i32_1 : i32, i32, i32
  }
  func.func @transform_5(%arg0: i32) -> (i32, i32, i32) {
    %c0_i32 = arith.constant 0 : i32
    %c0_i32_0 = arith.constant 0 : i32
    %c0_i32_1 = arith.constant 0 : i32
    %c0_i32_2 = arith.constant 0 : i32
    return %c0_i32, %c0_i32_0, %c0_i32_1 : i32, i32, i32
  }
  func.func @transform_6(%arg0: i32) -> (i32, i32, i32) {
    %c0_i32 = arith.constant 0 : i32
    %c0_i32_0 = arith.constant 0 : i32
    %c0_i32_1 = arith.constant 0 : i32
    %c0_i32_2 = arith.constant 0 : i32
    return %c0_i32, %c0_i32_0, %c0_i32_1 : i32, i32, i32
  }
  func.func @transform_7(%arg0: i32) -> (i32, i32, i32) {
    %c0_i32 = arith.constant 0 : i32
    %c0_i32_0 = arith.constant 0 : i32
    %c0_i32_1 = arith.constant 0 : i32
    %c0_i32_2 = arith.constant 0 : i32
    return %c0_i32, %c0_i32_0, %c0_i32_1 : i32, i32, i32
  }
  func.func @transform_8(%arg0: i32) -> (i32, i32, i32) {
    %c0_i32 = arith.constant 0 : i32
    %c0_i32_0 = arith.constant 0 : i32
    %c0_i32_1 = arith.constant 0 : i32
    %c0_i32_2 = arith.constant 0 : i32
    return %c0_i32, %c0_i32_0, %c0_i32_1 : i32, i32, i32
  }
  func.func @transform_9(%arg0: i32) -> (i32, i32) {
    %c0_i32 = arith.constant 0 : i32
    %c0_i32_0 = arith.constant 0 : i32
    %c0_i32_1 = arith.constant 0 : i32
    return %c0_i32, %c0_i32_0 : i32, i32
  }
  func.func @transform_10(%arg0: i32) -> (i32, i32) {
    %c0_i32 = arith.constant 0 : i32
    %c0_i32_0 = arith.constant 0 : i32
    %c0_i32_1 = arith.constant 0 : i32
    return %c0_i32, %c0_i32_0 : i32, i32
  }
  func.func @transform_11(%arg0: i32) -> (i32, i32) {
    %c0_i32 = arith.constant 0 : i32
    %c0_i32_0 = arith.constant 0 : i32
    %c0_i32_1 = arith.constant 0 : i32
    return %c0_i32, %c0_i32_0 : i32, i32
  }
  func.func @transform_12(%arg0: i32) -> (i32, i32, i32) {
    %c0_i32 = arith.constant 0 : i32
    %c0_i32_0 = arith.constant 0 : i32
    %c0_i32_1 = arith.constant 0 : i32
    return %arg0, %c0_i32, %c0_i32_0 : i32, i32, i32
  }
}

</mosaic_0001>

<bundles_post_ra>
// kernel: tpu_custom_call.1
= control target key start
LH: loop header
LB: loop body
LE: loop exit
PB: predicated region body
PF: predicated region fallthrough
CT: control target
= control target key end

     0   :  { %s2720_s0 = inlined_call_operand.hbm [shape: f32[2,8,32], index: 0, kind: input, shape index: {}]   ;;  %s2721_s1 = inlined_call_operand.hbm [shape: f32[2,8,32], index: 1, kind: input, shape index: {}]   ;;  %s2722_s2 = inlined_call_operand.hbm [shape: bf16[4,8,32], index: 2, kind: input, shape index: {}]   ;;  %s2723_s3 = inlined_call_operand.hbm [shape: bf16[4,8,32], index: 3, kind: input, shape index: {}]   ;;  %s2724_s4 = inlined_call_operand.hbm [shape: bf16[4,8,32], index: 4, kind: input, shape index: {}]   ;;  %s2725_s5 = inlined_call_operand.vmem [shape: f32[4,1,8], index: 5, kind: input, shape index: {}]   ;;  %s2726_s6 = inlined_call_operand.hbm [shape: f32[4,1,8], index: 6, kind: input, shape index: {}]   ;;  %s2727_s7 = inlined_call_operand.hbm [shape: f32[4,1,8], index: 7, kind: input, shape index: {}]   ;;  %s2728_s8 = inlined_call_operand.hbm [shape: bf16[4,8,32], index: 8, kind: input, shape index: {}]   ;;  %s2729_s9 = inlined_call_operand.vmem [shape: f32[1,32], index: 9, kind: input, shape index: {}]   ;;  %s2730_s10 = inlined_call_operand.vmem [shape: f32[1,32], index: 10, kind: input, shape index: {}]   ;;  %s2731_s11 = inlined_call_operand.vmem [shape: f32[1,32], index: 11, kind: input, shape index: {}]   ;;  %s2732_s12 = inlined_call_operand.hbm [shape: f32[2,8,32], index: 12, kind: output, shape index: {}]  }
   0x1   :  { %2737 = sst [smem:[#allocation27_spill]] %s2722_s2 }
   0x2   :  { %2738 = sst [smem:[#allocation28_spill]] %s2723_s3 }
   0x3   :  { %2739 = sst [smem:[#allocation29_spill]] %s2724_s4 }
   0x4   :  { %2740 = sst [smem:[#allocation30_spill]] %s2726_s6 }
   0x5   :  { %2741 = sst [smem:[#allocation31_spill]] %s2727_s7 }
   0x6   :  { %2742 = sst [smem:[#allocation32_spill]] %s2728_s8 }
   0x7   :  { %2743 = sst [smem:[#allocation33_spill]] %s2731_s11 }
   0x8   :  { %2744 = sst [smem:[#allocation34_spill]] %s2732_s12 }
   0x9   :  { %17 = vsyncpa [#allocation3], 0 }
   0xa   :  { %19 = vsyncpa [#allocation3 + $0x1], 0 }
   0xb   :  { %20 = vsyncpa [#allocation6], 0 }
   0xc   :  { %22 = vsyncpa [#allocation6 + $0x1], 0 }
   0xd   :  { %23 = vsyncpa [#allocation9], 0 }
   0xe   :  { %24 = vsyncpa [#allocation12], 0 }
   0xf   :  { %25 = vsyncpa [#allocation15], 0 }
  0x10   :  { %26 = vsyncpa [#allocation4], 0 }
  0x11   :  { %28 = vsyncpa [#allocation4 + $0x1], 0  ;;  %s2358_s21 = smov 0   ;;  %s2360_s22 = smov 0  }
  0x12   :  { %s2362_s23 = smov 0   ;;  %s2364_s24 = smov 0  }
  0x13 LB: > { %2745 = sst [smem:[#allocation24_spill]] %s2276_s23  ;;  %s2382_s28 = sadd.s32 4294967295, %s2280_s24   ;;  %s2280_s24 = sphi %s2364_s24, %s2765_s24   ;;  %s2276_s23 = sphi %s2362_s23, %s2767_s23   ;;  %s2272_s22 = sphi %s2360_s22, %s2769_s22   ;;  %s2268_s21 = sphi %s2358_s21, %s2768_s21  }
  0x14   : > { %s2746_s2 = sld [smem:[#allocation27_spill]]  ;;  %p1720_p0 = scmp.ge.s32.totalorder %s2280_s24, 1 }
  0x15   : > { %p55_p1 = scmp.eq.s32.totalorder %s2382_s28, 0  ;;  %p327_p2 = scmp.lt.s32.totalorder %s2280_s24, 3 }
  0x16   : > { %s2282_s30 = smov [#allocation7]   ;;  %s2748_s3 = sld [smem:[#allocation28_spill]] }
  0x17   : > { %p2387_p3 = pnand %p1720_p0, %p327_p2  ;;  %s340_s13 = sshll.u32 %s2282_s30, 4  ;;  %s341_s13 = int_to_ptr.vmem [resolvable:$true] %s340_s13 }
  0x18   : > { %s2750_s6 = sld [smem:[#allocation30_spill]]  ;;  %s2283_s25 = smov [#allocation8]  }
  0x19   : > { %p1816_p4 = pneg %p2387_p3  ;;  %s354_s26 = sshll.u32 %s2283_s25, 4  ;;  %s355_s26 = int_to_ptr.vmem [resolvable:$true] %s354_s26 }
  0x1a   : > { %s338_s27 = sshll.u32 %s2746_s2, 4  ;;  %s2284_s30 = smov 64   ;;  %s339_s27 = int_to_ptr.hbm [resolvable:$true] %s338_s27 }
  0x1b   : > { %p2399_p6 = pnand %p1816_p4, %p55_p1  ;;  %s2285_s2 = smov 4  }
  0x1c   : > { %s352_s16 = sshll.u32 %s2748_s3, 4  ;;  %s2286_s14 = smov [#allocation11]   ;;  %s353_s16 = int_to_ptr.hbm [resolvable:$true] %s352_s16 }
  0x1d   : > { %1819 = dma.hbm_to_vmem [thread:$0]  (!%p2399_p6), %s339_s27, 256, %s341_s13, [#allocation6], %s2284_s30, %s2284_s30, %s2285_s2  }
  0x1e   : > { %s383_s20 = sshll.u32 %s2750_s6, 4  ;;  %s385_s15 = sshll.u32 %s2286_s14, 4  ;;  %s384_s20 = int_to_ptr.hbm [resolvable:$true] %s383_s20  ;;  %s386_s15 = int_to_ptr.vmem [resolvable:$true] %s385_s15 }
  0x1f   : > { %1822 = dma.hbm_to_vmem [thread:$0]  (!%p2399_p6), %s353_s16, 256, %s355_s26, [#allocation9], %s2284_s30, %s2284_s30, %s2285_s2  }
  0x20   : > { %s2751_s4 = sld [smem:[#allocation29_spill]]  ;;  %s2287_s3 = smov 16  }
  0x21   : > { %s2288_s6 = smov 1   ;;  %s2289_s27 = smov [#allocation10]  }
  0x22   : > { %1828 = dma.hbm_to_vmem [thread:$0]  (!%p2399_p6), %s384_s20, 64, %s386_s15, [#allocation12], %s2287_s3, %s2287_s3, %s2288_s6  }
  0x23   : > { %s368_s13 = sshll.u32 %s2289_s27, 4  ;;  %s2752_s7 = sld [smem:[#allocation31_spill]]  ;;  %s369_s13 = int_to_ptr.vmem [resolvable:$true] %s368_s13 }
  0x24   : > { %s2753_s8 = sld [smem:[#allocation32_spill]]  ;;  %s2290_s15 = smov [#allocation13]  }
  0x25   : > { %s399_s11 = sshll.u32 %s2290_s15, 4  ;;  %s2291_s12 = smov [#allocation14]   ;;  %s400_s11 = int_to_ptr.vmem [resolvable:$true] %s399_s11 }
  0x26   : > { %s366_s25 = sshll.u32 %s2751_s4, 4  ;;  %s413_s18 = sshll.u32 %s2291_s12, 4  ;;  %s367_s25 = int_to_ptr.hbm [resolvable:$true] %s366_s25  ;;  %s414_s18 = int_to_ptr.vmem [resolvable:$true] %s413_s18 }
  0x27   : > { %1825 = dma.hbm_to_vmem [thread:$0]  (!%p2399_p6), %s367_s25, 256, %s369_s13, [#allocation9], %s2284_s30, %s2284_s30, %s2285_s2  }
  0x28   : > { %s1719_s19 = sadd.s32 4294967294, %s2280_s24   ;;  %s2441_s25 = sadd.s32 1, %s2280_s24  }
  0x29   : > { %s397_s16 = sshll.u32 %s2752_s7, 4  ;;  %2754 = sst [smem:[#allocation25_spill]] %s2441_s25  ;;  %s398_s16 = int_to_ptr.hbm [resolvable:$true] %s397_s16 }
  0x2a   : > { %s411_s14 = sshll.u32 %s2753_s8, 4  ;;  %s38_s27 = ssub.s32 %s2280_s24, %s2441_s25  ;;  %s412_s14 = int_to_ptr.hbm [resolvable:$true] %s411_s14 }
  0x2b   : > { %1831 = dma.hbm_to_vmem [thread:$0]  (!%p2399_p6), %s398_s16, 64, %s400_s11, [#allocation12], %s2287_s3, %s2287_s3, %s2288_s6  }
  0x2c   : > { %1834 = dma.hbm_to_vmem [thread:$0]  (!%p2399_p6), %s412_s14, 256, %s414_s18, [#allocation15], %s2284_s30, %s2284_s30, %s2285_s2  }
  0x2d   : > { %s41_s13 = sadd.s32 1, %s2276_s23  ;;  %p39_p7 = scmp.eq.s32.totalorder %s38_s27, 0 }
  0x2e   : > { %p48_p8 = scmp.ne.s32.totalorder %s2276_s23, %s2272_s22  ;;  %p49_p9 = scmp.eq.s32.totalorder %s2280_s24, 0 }
  0x2f   : > { %p54_p10 = scmp.ne.s32.totalorder %s2272_s22, %s2268_s21  ;;  %p314_p13 = scmp.eq.s32.totalorder %s2382_s28, 1 }
  0x30   : > { %s2452_s3 = scalar_select %p39_p7, %s2276_s23, %s41_s13  }
  0x31   : > { %p2454_p11 = por %p49_p9, %p48_p8  ;;  %p2460_p12 = por %p55_p1, %p54_p10 }
  0x32   : > { %2755 = sst [smem:[#allocation26_spill]] %s2452_s3  ;;  %p320_p0 = scmp.eq.s32.totalorder %s1719_s19, 1 }
  0x33   : > { %p1852_p2 = scmp.lt.s32.totalorder %s2280_s24, 2  ;;  %s436_s17 = sand.u32 1, %s2276_s23  }
  0x34   : > { %p2467_p4 = por %p314_p13, %p48_p8  ;;  %p2471_p6 = por %p320_p0, %p54_p10 }
  0x35   : > { %s2475_s20 = sshll.u32 %s436_s17, 3  ;;  %s1729_s26 = sshll.u32 %s2280_s24, 3 }
  0x36   : > { %s444_s11 = scalar_lea.hbm %s2720_s0, %s1729_s26  ;;  %s440_s12 = scalar_lea.vmem [#allocation2], %s2475_s20 }
  0x37   : > { %s448_s18 = sshll.u32 %s440_s12, 4  ;;  %s446_s19 = sshll.u32 %s444_s11, 4  ;;  %s449_s18 = int_to_ptr.vmem [resolvable:$true] %s448_s18  ;;  %s447_s19 = int_to_ptr.hbm [resolvable:$true] %s446_s19 }
  0x38   : > { %p2484_p7 = pnand %p1852_p2, %p2454_p11  ;;  %s463_s7 = scalar_lea.hbm %s2721_s1, %s1729_s26 }
  0x39   : > { %s455_s8 = sand.u32 1, %s2280_s24   ;;  %s437_s3 = scalar_lea.sflag [#allocation3], %s436_s17 }
  0x3a   : > { %s2134_s14 = sshra.s32 %s447_s19, 4  ;;  %p2138_p9 = pneg %p2484_p7  ;;  %s2135_s14 = int_to_ptr.hbm [resolvable:$true] %s2134_s14 }
  0x3b   : > { %s2136_s15 = scalar_lea.hbm %s2135_s14, 8  ;;  %s2141_s12 = scalar_lea.hbm %s2720_s0, 16 }
  0x3c   : > { %p2137_p8 = scmp.ne.s32.totalorder %s2135_s14, %s2136_s15  ;;  %p2142_p13 = scmp.lt.s32.totalorder %s2135_s14, %s2720_s0 }
  0x3d   : > { %p2143_p0 = scmp.lt.s32.totalorder %s2141_s12, %s2136_s15 }
  0x3e   : > { %p2139_p10 = pnand %p2138_p9, %p2137_p8 }
  0x3f   : > { %p2144_p2 = por %p2143_p0, %p2142_p13 }
  0x40   : > { %p2140_p11 = pneg %p2139_p10 }
  0x42   : > { %p2145_p5 = pnand %p2144_p2, %p2140_p11 }
  0x44   : > { %2148 = shalt.err (!%p2145_p5)
}
  0x45   : > { %1838 = dma.hbm_to_vmem [thread:$0]  (!%p2484_p7), %s447_s19, 128, %s449_s18, %s437_s3  }
  0x46   : > { %s465_s17 = sshll.u32 %s463_s7, 4  ;;  %s459_s26 = scalar_lea.vmem [#allocation5], %s2475_s20  ;;  %s466_s17 = int_to_ptr.hbm [resolvable:$true] %s465_s17 }
  0x47   : > { %s467_s23 = sshll.u32 %s459_s26, 4  ;;  %s456_s6 = scalar_lea.sflag [#allocation6], %s455_s8  ;;  %s468_s23 = int_to_ptr.vmem [resolvable:$true] %s467_s23 }
  0x48   : > { %s2164_s11 = sshra.s32 %s466_s17, 4  ;;  %s2171_s12 = scalar_lea.hbm %s2721_s1, 16  ;;  %s2165_s11 = int_to_ptr.hbm [resolvable:$true] %s2164_s11 }
  0x49   : > { %s2166_s25 = scalar_lea.hbm %s2165_s11, 8  ;;  %p2172_p5 = scmp.lt.s32.totalorder %s2165_s11, %s2721_s1 }
  0x4a   : > { %p2167_p8 = scmp.ne.s32.totalorder %s2165_s11, %s2166_s25  ;;  %p2173_p13 = scmp.lt.s32.totalorder %s2171_s12, %s2166_s25 }
  0x4c   : > { %p2169_p10 = pnand %p2167_p8, %p2138_p9  ;;  %p2174_p0 = por %p2173_p13, %p2172_p5 }
  0x4e   : > { %p2170_p11 = pneg %p2169_p10 }
  0x50   : > { %p2175_p2 = pnand %p2174_p0, %p2170_p11 }
  0x52   : > { %2178 = shalt.err (!%p2175_p2)
}
  0x53   : > { %1841 = dma.hbm_to_vmem [thread:$0]  (!%p2484_p7), %s466_s17, 128, %s468_s23, %s456_s6  }
  0x54   : > { %476 = sbr.rel (%p2387_p3) target bundleno = 1123 (0x463), region = 68  ;;  %s2520_s7 = sand.u32 (!%p2387_p3), 1, %s2272_s22  }
  0x55   : > { %s2523_s8 = sshll.u32 (!%p2387_p3), %s2520_s7, 3  ;;  %s479_s20 = scalar_lea.sflag (!%p2387_p3), [#allocation3], %s2520_s7 }
  0x56   : > { %s482_s25 = scalar_lea.vmem (!%p2387_p3), [#allocation2], %s2523_s8 }
  0x59   : > { %2239 = dma.done.wait (%p2460_p12), %s479_s20, 128  }
  0x5a   : > { %2241 = vsyncadd (%p2460_p12), %s479_s20, 4294967168  ;;  %s488_s23 = sand.u32 1, %s2382_s28   ;;  %s492_s18 = scalar_lea.vmem [#allocation5], %s2523_s8 }
  0x5b   : > { %s489_s29 = scalar_lea.sflag [#allocation6], %s488_s23 }
  0x5c   : > { %2243 = dma.done.wait (%p2460_p12), %s489_s29, 128  }
  0x5d   : > { %2245 = vsyncadd (%p2460_p12), %s489_s29, 4294967168 }
  0x5e   : > { %2247 = dma.done.wait (%p55_p1), [#allocation6], 256  }
  0x5f   : > { %2249 = vsyncadd (%p55_p1), [#allocation6], 4294967040 }
  0x60   : > { %2251 = dma.done.wait (%p55_p1), [#allocation9], 512  }
  0x61   : > { %2253 = vsyncadd (%p55_p1), [#allocation9], 4294966784 }
  0x62   : > { %2255 = dma.done.wait (%p55_p1), [#allocation12], 128  }
  0x63   : > { %2257 = vsyncadd (%p55_p1), [#allocation12], 4294967168 }
  0x64   : > { %2259 = dma.done.wait (%p55_p1), [#allocation15], 256  }
  0x65   : > { %2261 = vsyncadd (%p55_p1), [#allocation15], 4294967040  ;;  %vm596_vm0 = vcmask 261120   ;;  %v576_v0 = vld [vmem:[#allocation7] sm:$0xf]  ;;  %v571_v9 = vld [vmem:[%s492_s18] sm:$0xff] }
  0x66   : > { %v577_v1 = vld [vmem:[#allocation7 + $0x4] sm:$0xf]  ;;  %v578_v2 = vld [vmem:[#allocation7 + $0x8] sm:$0xf]  ;;  %v601_v3 = vsel %vm596_vm0, %v576_v0, 0  ;;  %v574_v28 = vpack.c.bf16 %v571_v9, %v571_v9  ;;  %vm1026_vm1 = vcmask 64512  }
  0x67   : > { %v617_v4 = vsel %vm596_vm0, %v577_v1, 0  ;;  %v633_v5 = vsel %vm596_vm0, %v578_v2, 0  ;;  %v579_v6 = vld [vmem:[#allocation7 + $0xc] sm:$0xf]  ;;  %610 = vmatpush.bf16.xpose.msra.mxu0 %v601_v3  ;;  %v668_v10 = vld [vmem:[#allocation8] sm:$0xf] }
  0x68   : > { %v570_v7 = vld [vmem:[%s482_s25] sm:$0xff]  ;;  %626 = vmatpush.bf16.xpose.msra.mxu1 %v617_v4  ;;  %v649_v8 = vsel %vm596_vm0, %v579_v6, 0  ;;  %v669_v11 = vld [vmem:[#allocation8 + $0x4] sm:$0xf]  ;;  %642 = vmatpush.bf16.xpose.msra.mxu2 %v633_v5  ;;  %v692_v13 = vsel %vm596_vm0, %v668_v10, 0  ;;  %vm1262_vm2 = vcmask 1043456  }
  0x69   : > { %658 = vmatpush.bf16.xpose.msra.mxu3 %v649_v8  ;;  %v2557_v12 = vmul.f32 %v571_v9, %v570_v7  ;;  %v708_v14 = vsel %vm596_vm0, %v669_v11, 0  ;;  %v670_v15 = vld [vmem:[#allocation8 + $0x8] sm:$0xf]  ;;  %v671_v16 = vld [vmem:[#allocation8 + $0xc] sm:$0xf]  ;;  %v575_v37 = vpack.c.bf16 %v570_v7, %v570_v7  ;;  %s1783_s12 = sshll.u32 %s2382_s28, 3 }
  0x6a   : > { %v724_v17 = vsel %vm596_vm0, %v670_v15, 0  ;;  %v740_v18 = vsel %vm596_vm0, %v671_v16, 0  ;;  %v759_v19 = vld [vmem:[#allocation8] sm:$0xf]  ;;  %v760_v20 = vld [vmem:[#allocation8 + $0x4] sm:$0xf] }
  0x6b   : > { %v573_v21 = vpack.c.bf16 %v2557_v12, %v2557_v12  ;;  %v783_v22 = vsel %vm596_vm0, %v759_v19, 0  ;;  %v799_v23 = vsel %vm596_vm0, %v760_v20, 0  ;;  %v761_v24 = vld [vmem:[#allocation8 + $0x8] sm:$0xf]  ;;  %v762_v25 = vld [vmem:[#allocation8 + $0xc] sm:$0xf] }
  0x6c   : > { %v815_v26 = vsel %vm596_vm0, %v761_v24, 0  ;;  %v831_v27 = vsel %vm596_vm0, %v762_v25, 0  ;;  %v852_v29 = vld [vmem:[#allocation10 + $0x8] sm:$0xf]  ;;  %v850_v30 = vld [vmem:[#allocation10] sm:$0xf] }
  0x6d   : > { %v851_v31 = vld [vmem:[#allocation10 + $0x4] sm:$0xf]  ;;  %v853_v32 = vld [vmem:[#allocation10 + $0xc] sm:$0xf]  ;;  %v903_v33 = vsel %vm596_vm0, %v852_v29, 0  ;;  %v871_v34 = vsel %vm596_vm0, %v850_v30, 0 }
  0x6e   : > { %1742 = vmatmul.msk.bf16.vlgmr.msra.gmra.mxu0 %vm596_vm0, %v573_v21  ;;  %v887_v35 = vsel %vm596_vm0, %v851_v31, 0  ;;  %v919_v36 = vsel %vm596_vm0, %v853_v32, 0  ;;  %v940_v38 = vld [vmem:[#allocation10 + $0x8] sm:$0xf]  ;;  %v941_v40 = vld [vmem:[#allocation10 + $0xc] sm:$0xf] }
  0x6f   : > { %701 = vmatpush.bf16.xpose.msrb.mxu0 %v692_v13  ;;  %1743 = vmatmul.msk.bf16.vlgmr.msra.gmra.mxu1 %vm596_vm0, %v573_v21  ;;  %v991_v39 = vsel %vm596_vm0, %v940_v38, 0  ;;  %v1007_v41 = vsel %vm596_vm0, %v941_v40, 0  ;;  %v938_v42 = vld [vmem:[#allocation10] sm:$0xf]  ;;  %v939_v43 = vld [vmem:[#allocation10 + $0x4] sm:$0xf] }
  0x70   : > { %717 = vmatpush.bf16.xpose.msrb.mxu1 %v708_v14  ;;  %733 = vmatpush.bf16.xpose.msrb.mxu2 %v724_v17  ;;  %v959_v44 = vsel %vm596_vm0, %v938_v42, 0  ;;  %v975_v45 = vsel %vm596_vm0, %v939_v43, 0  ;;  %v1907_v52 = vld [vmem:[#allocation11] ss:$0 sm:$0xff]  ;;  %v1908_v53 = vld [vmem:[#allocation11 + $0x1] ss:$0 sm:$0xff] }
  0x71   : > { %749 = vmatpush.bf16.xpose.msrb.mxu3 %v740_v18  ;;  %1744 = vmatmul.msk.bf16.vlgmr.msra.gmra.mxu2 %vm596_vm0, %v573_v21  ;;  %v1903_v60 = vld [vmem:[%s2725_s5] ss:$0 sm:$0xff]  ;;  %v1904_v63 = vld [vmem:[%s2725_s5 + $0x1] ss:$0 sm:$0xff]  ;;  %v1909_v0 = vld [vmem:[#allocation11 + $0x2] ss:$0 sm:$0xff] }
  0x72   : > { %1745 = vmatmul.msk.bf16.vlgmr.msra.gmra.mxu3 %vm596_vm0, %v573_v21  ;;  %v1910_v1 = vld [vmem:[#allocation11 + $0x3] ss:$0 sm:$0xff]  ;;  %v1905_v13 = vld [vmem:[%s2725_s5 + $0x2] ss:$0 sm:$0xff]  ;;  %v1906_v14 = vld [vmem:[%s2725_s5 + $0x3] ss:$0 sm:$0xff] }
  0x73   : > { %v1911_v21 = vld [vmem:[#allocation11] ss:$0 sm:$0xff]  ;;  %s2761_s23 = sld [smem:[#allocation34_spill]]  ;;  %s568_s28 = scalar_lea.vmem [#allocation16], %s2523_s8 }
  0x74   : > { %s2763_s27 = sld [smem:[#allocation33_spill]]  ;;  %s1566_s13 = sshll.u32 %s568_s28, 4  ;;  %s1567_s13 = int_to_ptr.vmem [resolvable:$true] %s1566_s13 }
  0x75   : > { %s1554_s26 = scalar_lea.sflag [#allocation4], %s2520_s7 }
  0x77   : > { %792 = vmatpush.bf16.xpose.msra.mxu0 %v783_v22  ;;  %v1912_v22 = vld [vmem:[#allocation11 + $0x1] ss:$0 sm:$0xff] }
  0x78   : > { %808 = vmatpush.bf16.xpose.msra.mxu1 %v799_v23  ;;  %824 = vmatpush.bf16.xpose.msra.mxu2 %v815_v26 }
  0x79   : > { %840 = vmatpush.bf16.xpose.msra.mxu3 %v831_v27  ;;  %s2762_s29 = smov %s2761_s23  ;;  %s1564_s18 = scalar_lea.hbm %s2761_s23, %s1783_s12 }
  0x7a   : > { %s1568_s17 = sshll.u32 %s1564_s18, 4  ;;  %s2214_s8 = scalar_lea.hbm %s2762_s29, 16  ;;  %s1569_s17 = int_to_ptr.hbm [resolvable:$true] %s1568_s17 }
  0x7b   : > { %s2208_s6 = sshra.s32 %s1569_s17, 4  ;;  %s2209_s6 = int_to_ptr.hbm [resolvable:$true] %s2208_s6 }
  0x7c   : > { %s2210_s11 = scalar_lea.hbm %s2209_s6, 8  ;;  %p2215_p7 = scmp.lt.s32.totalorder %s2209_s6, %s2762_s29 }
  0x7d   : > { %p2211_p1 = scmp.ne.s32.totalorder %s2209_s6, %s2210_s11  ;;  %p2216_p9 = scmp.lt.s32.totalorder %s2214_s8, %s2210_s11 }
  0x7e   : > { %1746 = vmatmul.msk.bf16.vlgmr.msrb.gmra.mxu0 %vm596_vm0, %v574_v28 }
  0x7f   : > { %1747 = vmatmul.msk.bf16.vlgmr.msrb.gmra.mxu1 %vm596_vm0, %v574_v28  ;;  %880 = vmatpush.bf16.xpose.msrb.mxu0 %v871_v34  ;;  %p2212_p3 = pnand %p2211_p1, %p2467_p4  ;;  %p2217_p8 = por %p2216_p9, %p2215_p7 }
  0x80   : > { %896 = vmatpush.bf16.xpose.msrb.mxu1 %v887_v35  ;;  %v1913_v35 = vld [vmem:[#allocation11 + $0x2] ss:$0 sm:$0xff] }
  0x81   : > { %1748 = vmatmul.msk.bf16.vlgmr.msrb.gmra.mxu2 %vm596_vm0, %v574_v28  ;;  %p2213_p12 = pneg %p2212_p3 }
  0x82   : > { %1749 = vmatmul.msk.bf16.vlgmr.msrb.gmra.mxu3 %vm596_vm0, %v574_v28  ;;  %912 = vmatpush.bf16.xpose.msrb.mxu2 %v903_v33 }
  0x83   : > { %928 = vmatpush.bf16.xpose.msrb.mxu3 %v919_v36  ;;  %v1914_v36 = vld [vmem:[#allocation11 + $0x3] ss:$0 sm:$0xff]  ;;  %p2218_p10 = pnand %p2217_p8, %p2213_p12 }
  0x8e   : > { %1750 = vmatmul.msk.bf16.vlgmr.msra.gmra.mxu0 %vm596_vm0, %v575_v37 }
  0x8f   : > { %1751 = vmatmul.msk.bf16.vlgmr.msra.gmra.mxu1 %vm596_vm0, %v575_v37  ;;  %968 = vmatpush.bf16.xpose.msra.mxu0 %v959_v44 }
  0x90   : > { %984 = vmatpush.bf16.xpose.msra.mxu1 %v975_v45 }
  0x91   : > { %1752 = vmatmul.msk.bf16.vlgmr.msra.gmra.mxu2 %vm596_vm0, %v575_v37 }
  0x92   : > { %1753 = vmatmul.msk.bf16.vlgmr.msra.gmra.mxu3 %vm596_vm0, %v575_v37  ;;  %1000 = vmatpush.bf16.xpose.msra.mxu2 %v991_v39 }
  0x93   : > { %1016 = vmatpush.bf16.xpose.msra.mxu3 %v1007_v41 }
  0x9e   : > { %1754 = vmatmul.msk.bf16.vlgmr.msrb.gmra.mxu0 %vm596_vm0, %v574_v28 }
  0x9f   : > { %1755 = vmatmul.msk.bf16.vlgmr.msrb.gmra.mxu1 %vm596_vm0, %v574_v28 }
  0xa1   : > { %1756 = vmatmul.msk.bf16.vlgmr.msrb.gmra.mxu2 %vm596_vm0, %v574_v28 }
  0xa2   : > { %1757 = vmatmul.msk.bf16.vlgmr.msrb.gmra.mxu3 %vm596_vm0, %v574_v28 }
  0xae   : > { %1758 = vmatmul.msk.bf16.vlgmr.msra.gmra.mxu0 %vm596_vm0, %v575_v37 }
  0xaf   : > { %1759 = vmatmul.msk.bf16.vlgmr.msra.gmra.mxu1 %vm596_vm0, %v575_v37 }
  0xb1   : > { %1760 = vmatmul.msk.bf16.vlgmr.msra.gmra.mxu2 %vm596_vm0, %v575_v37 }
  0xb2   : > { %1761 = vmatmul.msk.bf16.vlgmr.msra.gmra.mxu3 %vm596_vm0, %v575_v37 }
  0xeb   : > { %v612_v46 = vpop.f32.mrf.mxu0 }
  0xec   : > { %v628_v47 = vpop.f32.mrf.mxu1  ;;  %v613_v6 = vadd.f32 %v1903_v60, %v612_v46  ;;  %v1918_v60 = vld [vmem:[#allocation13 + $0x3] ss:$0 sm:$0xff] }
  0xed   : > { %v629_v7 = vadd.f32 %v1904_v63, %v628_v47  ;;  %v1916_v63 = vld [vmem:[#allocation13 + $0x1] ss:$0 sm:$0xff] }
  0xee   : > { %v664_v17 = vpack.c.bf16 %v613_v6, %v613_v6 }
  0xef   : > { %v665_v18 = vpack.c.bf16 %v629_v7, %v629_v7 }
  0xf3   : > { %v614_v50 = vpop.f32.mrf.mxu0 }
  0xf4   : > { %v644_v48 = vpop.f32.mrf.mxu2  ;;  %v630_v51 = vpop.f32.mrf.mxu1 }
  0xf5   : > { %v660_v49 = vpop.f32.mrf.mxu3  ;;  %v645_v23 = vadd.f32 %v1905_v13, %v644_v48 }
  0xf6   : > { %v661_v24 = vadd.f32 %v1906_v14, %v660_v49 }
  0xf7   : > { %v666_v31 = vpack.c.bf16 %v645_v23, %v645_v23 }
  0xf8   : > { %v667_v32 = vpack.c.bf16 %v661_v24, %v661_v24 }
  0xfb   : > { %v703_v56 = vpop.f32.mrf.mxu0 }
  0xfc   : > { %v646_v54 = vpop.f32.mrf.mxu2  ;;  %v719_v57 = vpop.f32.mrf.mxu1  ;;  %v704_v58 = vadd.f32 %v1907_v52, %v703_v56 }
  0xfd   : > { %v662_v55 = vpop.f32.mrf.mxu3  ;;  %v720_v59 = vadd.f32 %v1908_v53, %v719_v57 }
  0xfe   : > { %v755_v61 = vpack.c.bf16 %v704_v58, %v704_v58 }
  0xff   : > { %v756_v62 = vpack.c.bf16 %v720_v59, %v720_v59  ;;  %v1917_v59 = vld [vmem:[#allocation13 + $0x2] ss:$0 sm:$0xff] }
 0x100   : > { %v1031_v2 = vsel %vm1026_vm1, %v755_v61, 0 }
 0x101   : > { %v1050_v3 = vsel %vm1026_vm1, %v756_v62, 0  ;;  %1040 = vmatpush.bf16.xpose.msrb.mxu0 %v1031_v2  ;;  %v1915_v62 = vld [vmem:[#allocation13] ss:$0 sm:$0xff]  ;;  %v1922_v2 = vld [vmem:[#allocation13 + $0x3] ss:$0 sm:$0xff] }
 0x102   : > { %1059 = vmatpush.bf16.xpose.msrb.mxu1 %v1050_v3 }
 0x103   : > { %v705_v10 = vpop.f32.mrf.mxu0 }
 0x104   : > { %v735_v4 = vpop.f32.mrf.mxu2  ;;  %v721_v11 = vpop.f32.mrf.mxu1  ;;  %v1920_v10 = vld [vmem:[#allocation13 + $0x1] ss:$0 sm:$0xff] }
 0x105   : > { %v751_v5 = vpop.f32.mrf.mxu3  ;;  %v736_v8 = vadd.f32 %v1909_v0, %v735_v4  ;;  %v1921_v0 = vld [vmem:[#allocation13 + $0x2] ss:$0 sm:$0xff] }
 0x106   : > { %v752_v9 = vadd.f32 %v1910_v1, %v751_v5 }
 0x107   : > { %v757_v15 = vpack.c.bf16 %v736_v8, %v736_v8 }
 0x108   : > { %v758_v16 = vpack.c.bf16 %v752_v9, %v752_v9  ;;  %1762 = vmatmul.msk.bf16.vlgmr.msrb.gmra.mxu0 %vm1026_vm1, %v664_v17  ;;  %v1919_v9 = vld [vmem:[#allocation13] ss:$0 sm:$0xff] }
 0x109   : > { %v1069_v19 = vsel %vm1026_vm1, %v757_v15, 0  ;;  %1763 = vmatmul.msk.bf16.vlgmr.msrb.gmra.mxu1 %vm1026_vm1, %v665_v18 }
 0x10a   : > { %v1088_v20 = vsel %vm1026_vm1, %v758_v16, 0  ;;  %1078 = vmatpush.bf16.xpose.msrb.mxu2 %v1069_v19 }
 0x10b   : > { %1097 = vmatpush.bf16.xpose.msrb.mxu3 %v1088_v20  ;;  %v794_v27 = vpop.f32.mrf.mxu0 }
 0x10c   : > { %v737_v25 = vpop.f32.mrf.mxu2  ;;  %v810_v28 = vpop.f32.mrf.mxu1  ;;  %v795_v29 = vadd.f32 %v1911_v21, %v794_v27 }
 0x10d   : > { %v753_v26 = vpop.f32.mrf.mxu3  ;;  %v811_v30 = vadd.f32 %v1912_v22, %v810_v28 }
 0x10e   : > { %v846_v33 = vpack.c.bf16 %v795_v29, %v795_v29 }
 0x10f   : > { %v847_v34 = vpack.c.bf16 %v811_v30, %v811_v30 }
 0x110   : > { %v1104_v37 = vsel %vm1026_vm1, %v846_v33, 0 }
 0x111   : > { %1764 = vmatmul.msk.bf16.vlgmr.msrb.gmra.mxu2 %vm1026_vm1, %v666_v31  ;;  %v1120_v38 = vsel %vm1026_vm1, %v847_v34, 0  ;;  %1113 = vmatpush.bf16.xpose.msra.mxu0 %v1104_v37 }
 0x112   : > { %1765 = vmatmul.msk.bf16.vlgmr.msrb.gmra.mxu3 %vm1026_vm1, %v667_v32  ;;  %1129 = vmatpush.bf16.xpose.msra.mxu1 %v1120_v38 }
 0x113   : > { %v796_v43 = vpop.f32.mrf.mxu0 }
 0x114   : > { %v826_v39 = vpop.f32.mrf.mxu2  ;;  %v812_v44 = vpop.f32.mrf.mxu1 }
 0x115   : > { %v842_v40 = vpop.f32.mrf.mxu3  ;;  %v827_v41 = vadd.f32 %v1913_v35, %v826_v39 }
 0x116   : > { %v843_v42 = vadd.f32 %v1914_v36, %v842_v40 }
 0x117   : > { %v848_v45 = vpack.c.bf16 %v827_v41, %v827_v41 }
 0x118   : > { %v849_v46 = vpack.c.bf16 %v843_v42, %v843_v42  ;;  %1766 = vmatmul.msk.bf16.vlgmr.msra.gmra.mxu0 %vm1026_vm1, %v664_v17 }
 0x119   : > { %v1136_v47 = vsel %vm1026_vm1, %v848_v45, 0  ;;  %1767 = vmatmul.msk.bf16.vlgmr.msra.gmra.mxu1 %vm1026_vm1, %v665_v18 }
 0x11a   : > { %v1152_v48 = vsel %vm1026_vm1, %v849_v46, 0  ;;  %1145 = vmatpush.bf16.xpose.msra.mxu2 %v1136_v47 }
 0x11b   : > { %1161 = vmatpush.bf16.xpose.msra.mxu3 %v1152_v48  ;;  %v882_v51 = vpop.f32.mrf.mxu0 }
 0x11c   : > { %v828_v49 = vpop.f32.mrf.mxu2  ;;  %v898_v52 = vpop.f32.mrf.mxu1  ;;  %v883_v5 = vadd.f32 %v1915_v62, %v882_v51 }
 0x11d   : > { %v844_v50 = vpop.f32.mrf.mxu3  ;;  %v899_v6 = vadd.f32 %v1916_v63, %v898_v52 }
 0x11e   : > { %v934_v16 = vpack.c.bf16 %v883_v5, %v883_v5 }
 0x11f   : > { %v935_v17 = vpack.c.bf16 %v899_v6, %v899_v6 }
 0x120   : > { %v1340_v29 = vsel %vm1262_vm2, %v934_v16, 0 }
 0x121   : > { %1768 = vmatmul.msk.bf16.vlgmr.msra.gmra.mxu2 %vm1026_vm1, %v666_v31  ;;  %v1359_v30 = vsel %vm1262_vm2, %v935_v17, 0 }
 0x122   : > { %1769 = vmatmul.msk.bf16.vlgmr.msra.gmra.mxu3 %vm1026_vm1, %v667_v32 }
 0x123   : > { %v884_v55 = vpop.f32.mrf.mxu0 }
 0x124   : > { %v914_v53 = vpop.f32.mrf.mxu2  ;;  %v900_v56 = vpop.f32.mrf.mxu1 }
 0x125   : > { %v930_v54 = vpop.f32.mrf.mxu3  ;;  %v915_v61 = vadd.f32 %v1917_v59, %v914_v53 }
 0x126   : > { %v931_v1 = vadd.f32 %v1918_v60, %v930_v54 }
 0x127   : > { %v936_v3 = vpack.c.bf16 %v915_v61, %v915_v61 }
 0x128   : > { %v937_v8 = vpack.c.bf16 %v931_v1, %v931_v1 }
 0x129   : > { %v1378_v15 = vsel %vm1262_vm2, %v936_v3, 0 }
 0x12a   : > { %v1397_v22 = vsel %vm1262_vm2, %v937_v8, 0 }
 0x12b   : > { %v970_v18 = vpop.f32.mrf.mxu0 }
 0x12c   : > { %v916_v57 = vpop.f32.mrf.mxu2  ;;  %v986_v19 = vpop.f32.mrf.mxu1  ;;  %v971_v23 = vadd.f32 %v1919_v9, %v970_v18 }
 0x12d   : > { %v932_v58 = vpop.f32.mrf.mxu3  ;;  %v987_v24 = vadd.f32 %v1920_v10, %v986_v19 }
 0x12e   : > { %v1022_v26 = vpack.c.bf16 %v971_v23, %v971_v23 }
 0x12f   : > { %v1023_v27 = vpack.c.bf16 %v987_v24, %v987_v24 }
 0x130   : > { %v1264_v31 = vsel %vm1262_vm2, %v1022_v26, 0 }
 0x131   : > { %v1283_v32 = vsel %vm1262_vm2, %v1023_v27, 0  ;;  %1273 = vmatpush.bf16.msrb.mxu0 %v1264_v31 }
 0x132   : > { %1292 = vmatpush.bf16.msrb.mxu1 %v1283_v32 }
 0x133   : > { %v972_v34 = vpop.f32.mrf.mxu0 }
 0x134   : > { %v1002_v4 = vpop.f32.mrf.mxu2  ;;  %v988_v35 = vpop.f32.mrf.mxu1 }
 0x135   : > { %v1003_v7 = vadd.f32 %v1921_v0, %v1002_v4  ;;  %v1018_v11 = vpop.f32.mrf.mxu3  ;;  %1349 = vmatpush.bf16.msra.mxu0 %v1340_v29 }
 0x136   : > { %v1019_v14 = vadd.f32 %v1922_v2, %v1018_v11  ;;  %1368 = vmatpush.bf16.msra.mxu1 %v1359_v30 }
 0x137   : > { %v1024_v13 = vpack.c.bf16 %v1003_v7, %v1003_v7 }
 0x138   : > { %v1025_v21 = vpack.c.bf16 %v1019_v14, %v1019_v14 }
 0x139   : > { %v1302_v20 = vsel %vm1262_vm2, %v1024_v13, 0 }
 0x13a   : > { %1311 = vmatpush.bf16.msrb.mxu2 %v1302_v20  ;;  %v1321_v25 = vsel %vm1262_vm2, %v1025_v21, 0 }
 0x13b   : > { %1330 = vmatpush.bf16.msrb.mxu3 %v1321_v25 }
 0x13c   : > { %v1004_v28 = vpop.f32.mrf.mxu2 }
 0x13d   : > { %v1020_v33 = vpop.f32.mrf.mxu3 }
 0x13e   : > { %1387 = vmatpush.bf16.msra.mxu2 %v1378_v15 }
 0x13f   : > { %1406 = vmatpush.bf16.msra.mxu3 %v1397_v22 }
 0x185   : > { %v2633_v36 = vpop.f32.mrf.mxu0 }
 0x186   : > { %v1061_v37 = vpop.f32.mrf.mxu1  ;;  %v1167_v38 = vsel %vm1026_vm1, %v2633_v36, -inf }
 0x187   : > { %1168 = vmax.xlane.f32.xlu2 %v1167_v38  ;;  %v1170_v41 = vsel %vm1026_vm1, %v1061_v37, -inf }
 0x18d   : > { %v1044_v39 = vpop.f32.mrf.mxu0 }
 0x18e   : > { %v1063_v40 = vpop.f32.mrf.mxu1 }
 0x18f   : > { %1171 = vmax.xlane.f32.xlu2 %v1170_v41 }
 0x194   : > { %v1080_v42 = vpop.f32.mrf.mxu2 }
 0x195   : > { %v1099_v43 = vpop.f32.mrf.mxu3  ;;  %v1173_v45 = vsel %vm1026_vm1, %v1080_v42, -inf  ;;  %v1115_v46 = vpop.f32.mrf.mxu0 }
 0x196   : > { %v1176_v44 = vsel %vm1026_vm1, %v1099_v43, -inf  ;;  %1174 = vmax.xlane.f32.xlu0 %v1173_v45  ;;  %v1131_v47 = vpop.f32.mrf.mxu1  ;;  %v1179_v59 = vsel %vm1026_vm1, %v1115_v46, -inf }
 0x197   : > { %1177 = vmax.xlane.f32.xlu1 %v1176_v44  ;;  %v1182_v58 = vsel %vm1026_vm1, %v1131_v47, -inf }
 0x19c   : > { %v1082_v48 = vpop.f32.mrf.mxu2 }
 0x19d   : > { %v1101_v49 = vpop.f32.mrf.mxu3  ;;  %v1117_v50 = vpop.f32.mrf.mxu0 }
 0x19e   : > { %v1133_v51 = vpop.f32.mrf.mxu1  ;;  %v1422_v49 = vld [vmem:[#allocation14 + $0x8] sm:$0xf]  ;;  %v1423_v50 = vld [vmem:[#allocation14 + $0xc] sm:$0xf] }
 0x1a4   : > { %v1147_v52 = vpop.f32.mrf.mxu2 }
 0x1a5   : > { %v1163_v53 = vpop.f32.mrf.mxu3  ;;  %v1185_v55 = vsel %vm1026_vm1, %v1147_v52, -inf }
 0x1a6   : > { %v1188_v54 = vsel %vm1026_vm1, %v1163_v53, -inf  ;;  %1186 = vmax.xlane.f32.xlu0 %v1185_v55  ;;  %v1421_v55 = vld [vmem:[#allocation14 + $0x4] sm:$0xf] }
 0x1a7   : > { %1189 = vmax.xlane.f32.xlu1 %v1188_v54  ;;  %v1420_v54 = vld [vmem:[#allocation14] sm:$0xf] }
 0x1ac   : > { %v1149_v56 = vpop.f32.mrf.mxu2 }
 0x1ad   : > { %v1165_v57 = vpop.f32.mrf.mxu3  ;;  %v1428_v56 = vsel %vm1262_vm2, %v1420_v54, 0 }
 0x1ae   : > { %1180 = vmax.xlane.f32.xlu0 %v1179_v59  ;;  %v1447_v57 = vsel %vm1262_vm2, %v1421_v55, 0 }
 0x1af   : > { %1183 = vmax.xlane.f32.xlu1 %v1182_v58 }
 0x1fa   : > { %v1169_v62 = vpop.xlane.xlu2 %1168 }
 0x202   : > { %v1172_v11 = vpop.xlane.xlu2 %1171 }
 0x209   : > { %v1175_v61 = vpop.xlane.xlu0 %1174 }
 0x20a   : > { %v1178_v60 = vpop.xlane.xlu1 %1177 }
 0x219   : > { %v1187_v0 = vpop.xlane.xlu0 %1186 }
 0x21a   : > { %v1190_v63 = vpop.xlane.xlu1 %1189  ;;  %v1193_v2 = vmax.f32 %v1175_v61, %v1187_v0 }
 0x21b   : > { %v1194_v1 = vmax.f32 %v1178_v60, %v1190_v63 }
 0x21c   : > { %v1197_v5 = vsub.f32 %v1080_v42, %v1193_v2  ;;  %v1209_v6 = vsub.f32 %v1147_v52, %v1193_v2  ;;  %v1466_v52 = vsel %vm1262_vm2, %v1422_v49, 0 }
 0x21d   : > { %v1198_v3 = vsub.f32 %v1099_v43, %v1194_v1  ;;  %v1210_v4 = vsub.f32 %v1163_v53, %v1194_v1  ;;  %v1485_v53 = vsel %vm1262_vm2, %v1423_v50, 0 }
 0x21e   : > { %v1203_v9 = vmul.f32 1.442695, %v1197_v5  ;;  %v1215_v10 = vmul.f32 1.442695, %v1209_v6 }
 0x21f   : > { %v1205_v7 = vmul.f32 1.442695, %v1198_v3  ;;  %v1217_v8 = vmul.f32 1.442695, %v1210_v4 }
 0x221   : > { %1926 = vpow2.f32 %v1205_v7  ;;  %v1181_v14 = vpop.xlane.xlu0 %1180 }
 0x222   : > { %1928 = vpow2.f32 %v1217_v8  ;;  %v1184_v13 = vpop.xlane.xlu1 %1183  ;;  %v1191_v16 = vmax.f32 %v1169_v62, %v1181_v14 }
 0x223   : > { %1930 = vpow2.f32 %v1203_v9  ;;  %v1192_v15 = vmax.f32 %v1172_v11, %v1184_v13 }
 0x224   : > { %1932 = vpow2.f32 %v1215_v10  ;;  %v1195_v19 = vsub.f32 %v2633_v36, %v1191_v16  ;;  %v1207_v20 = vsub.f32 %v1115_v46, %v1191_v16 }
 0x225   : > { %v1196_v17 = vsub.f32 %v1061_v37, %v1192_v15  ;;  %v1208_v18 = vsub.f32 %v1131_v47, %v1192_v15 }
 0x226   : > { %v1199_v24 = vmul.f32 1.442695, %v1195_v19  ;;  %v1211_v26 = vmul.f32 1.442695, %v1207_v20 }
 0x227   : > { %v1927_v21 = vpop.eup %1926  ;;  %v1201_v22 = vmul.f32 1.442695, %v1196_v17  ;;  %v1213_v23 = vmul.f32 1.442695, %v1208_v18 }
 0x228   : > { %v1929_v25 = vpop.eup %1928  ;;  %v1228_v27 = vsel %vm1026_vm1, %v1927_v21, 0.0  ;;  %v1254_v42 = vpack.c.bf16 %v1927_v21, %v1927_v21 }
 0x229   : > { %v1931_v28 = vpop.eup %1930  ;;  %v1258_v29 = vpack.c.bf16 %v1929_v25, %v1929_v25  ;;  %1934 = vpow2.f32 %v1201_v22  ;;  %1229 = vadd.xlane.f32.xlu1 %v1228_v27  ;;  %v1240_v39 = vsel %vm1026_vm1, %v1929_v25, 0.0 }
 0x22a   : > { %v1933_v30 = vpop.eup %1932  ;;  %1936 = vpow2.f32 %v1213_v23  ;;  %v1225_v31 = vsel %vm1026_vm1, %v1931_v28, 0.0  ;;  %v1253_v45 = vpack.c.bf16 %v1931_v28, %v1931_v28 }
 0x22b   : > { %v1257_v32 = vpack.c.bf16 %v1933_v30, %v1933_v30  ;;  %1938 = vpow2.f32 %v1199_v24  ;;  %1226 = vadd.xlane.f32.xlu2 %v1225_v31  ;;  %1773 = vmatmul.msk.bf16.vlgmr.msrb.gmra.mxu3 %vm1026_vm1, %v1258_v29  ;;  %v1237_v44 = vsel %vm1026_vm1, %v1933_v30, 0.0 }
 0x22c   : > { %1940 = vpow2.f32 %v1211_v26  ;;  %1494 = vmatpush.bf16.msrb.mxu3 %v1485_v53 }
 0x22d   : > { %1772 = vmatmul.msk.bf16.vlgmr.msrb.gmra.mxu2 %vm1026_vm1, %v1257_v32 }
 0x22e   : > { %1475 = vmatpush.bf16.msrb.mxu2 %v1466_v52 }
 0x22f   : > { %v1935_v33 = vpop.eup %1934 }
 0x230   : > { %v1937_v34 = vpop.eup %1936  ;;  %v1222_v35 = vsel %vm1026_vm1, %v1935_v33, 0.0  ;;  %v1252_v46 = vpack.c.bf16 %v1935_v33, %v1935_v33 }
 0x231   : > { %v1939_v36 = vpop.eup %1938  ;;  %v1256_v37 = vpack.c.bf16 %v1937_v34, %v1937_v34  ;;  %1223 = vadd.xlane.f32.xlu1 %v1222_v35  ;;  %v1234_v47 = vsel %vm1026_vm1, %v1937_v34, 0.0 }
 0x232   : > { %v1941_v38 = vpop.eup %1940  ;;  %v1219_v40 = vsel %vm1026_vm1, %v1939_v36, 0.0  ;;  %v1251_v48 = vpack.c.bf16 %v1939_v36, %v1939_v36 }
 0x233   : > { %v1255_v41 = vpack.c.bf16 %v1941_v38, %v1941_v38  ;;  %1241 = vadd.xlane.f32.xlu2 %v1240_v39  ;;  %1220 = vadd.xlane.f32.xlu0 %v1219_v40  ;;  %v1231_v43 = vsel %vm1026_vm1, %v1941_v38, 0.0 }
 0x234   : > { %1771 = vmatmul.msk.bf16.vlgmr.msrb.gmra.mxu1 %vm1026_vm1, %v1256_v37 }
 0x235   : > { %1770 = vmatmul.msk.bf16.vlgmr.msrb.gmra.mxu0 %vm1026_vm1, %v1255_v41  ;;  %1456 = vmatpush.bf16.msrb.mxu1 %v1447_v57  ;;  %v2292_v57 = vmov 32.0  }
 0x236   : > { %1437 = vmatpush.bf16.msrb.mxu0 %v1428_v56 }
 0x23b   : > { %1232 = vadd.xlane.f32.xlu2 %v1231_v43  ;;  %1238 = vadd.xlane.f32.xlu0 %v1237_v44 }
 0x23c   : > { %1777 = vmatmul.msk.bf16.vlgmr.msra.gmra.mxu3 %vm1026_vm1, %v1254_v42 }
 0x23d   : > { %1776 = vmatmul.msk.bf16.vlgmr.msra.gmra.mxu2 %vm1026_vm1, %v1253_v45 }
 0x243   : > { %1235 = vadd.xlane.f32.xlu0 %v1234_v47  ;;  %v1923_v47 = vld [vmem:[%s2729_s9] ss:$0 sm:$0xff] }
 0x244   : > { %1775 = vmatmul.msk.bf16.vlgmr.msra.gmra.mxu1 %vm1026_vm1, %v1252_v46 }
 0x245   : > { %1774 = vmatmul.msk.bf16.vlgmr.msra.gmra.mxu0 %vm1026_vm1, %v1251_v48 }
 0x29c   : > { %v1230_v60 = vpop.xlane.xlu1 %1229 }
 0x29e   : > { %v1227_v51 = vpop.xlane.xlu2 %1226 }
 0x2a4   : > { %v1224_v6 = vpop.xlane.xlu1 %1223 }
 0x2a6   : > { %v1221_v58 = vpop.xlane.xlu0 %1220  ;;  %v1242_v59 = vpop.xlane.xlu2 %1241 }
 0x2a7   : > { %v1246_v3 = vadd.f32 %v1242_v59, %v1230_v60 }
 0x2a9   : > { %1942 = vrcp.f32 %v1246_v3 }
 0x2ae   : > { %v1239_v61 = vpop.xlane.xlu0 %1238  ;;  %v1332_v62 = vpop.f32.mrf.mxu3 }
 0x2af   : > { %v1233_v4 = vpop.xlane.xlu2 %1232  ;;  %v1245_v7 = vadd.f32 %v1239_v61, %v1227_v51  ;;  %v1943_v17 = vpop.eup %1942 }
 0x2b0   : > { %v1313_v63 = vpop.f32.mrf.mxu2  ;;  %v1243_v11 = vadd.f32 %v1233_v4, %v1221_v58 }
 0x2b1   : > { %v1294_v0 = vpop.f32.mrf.mxu1  ;;  %1944 = vrcp.f32 %v1245_v7 }
 0x2b2   : > { %v1275_v1 = vpop.f32.mrf.mxu0 }
 0x2b6   : > { %v1236_v2 = vpop.xlane.xlu0 %1235  ;;  %v1334_v5 = vpop.f32.mrf.mxu3 }
 0x2b7   : > { %v1244_v9 = vadd.f32 %v1236_v2, %v1224_v6  ;;  %v1945_v20 = vpop.eup %1944 }
 0x2b8   : > { %v1315_v8 = vpop.f32.mrf.mxu2 }
 0x2b9   : > { %v1296_v10 = vpop.f32.mrf.mxu1  ;;  %1946 = vrcp.f32 %v1244_v9 }
 0x2ba   : > { %v1277_v13 = vpop.f32.mrf.mxu0  ;;  %1948 = vrcp.f32 %v1243_v11 }
 0x2bb   : > { %1950 = vrcp.f32 %v2292_v57 }
 0x2bf   : > { %v1408_v14 = vpop.f32.mrf.mxu3  ;;  %v1947_v24 = vpop.eup %1946 }
 0x2c0   : > { %v1389_v15 = vpop.f32.mrf.mxu2  ;;  %v1409_v16 = vadd.f32 %v1408_v14, %v1332_v62  ;;  %v1949_v27 = vpop.eup %1948  ;;  %v1924_v14 = vld [vmem:[%s2730_s10] ss:$0 sm:$0xff] }
 0x2c1   : > { %v1390_v18 = vadd.f32 %v1389_v15, %v1313_v63  ;;  %v1370_v19 = vpop.f32.mrf.mxu1  ;;  %v1951_v58 = vpop.eup %1950 }
 0x2c2   : > { %v1415_v21 = vmul.f32 %v1943_v17, %v1409_v16  ;;  %v1351_v22 = vpop.f32.mrf.mxu0  ;;  %v1371_v23 = vadd.f32 %v1370_v19, %v1294_v0  ;;  %v1517_v59 = vmul.f32 32.0, %v1951_v58  ;;  %vm1521_vm3 = vweird.f32 %v1951_v58  ;;  %v1925_v17 = vld [vmem:[%s2763_s27] ss:$0 sm:$0xff] }
 0x2c3   : > { %v1414_v25 = vmul.f32 %v1945_v20, %v1390_v18  ;;  %v1352_v26 = vadd.f32 %v1351_v22, %v1275_v1 }
 0x2c4   : > { %v1419_v28 = vpack.c.bf16 %v1415_v21, %v1415_v21  ;;  %v1413_v29 = vmul.f32 %v1947_v24, %v1371_v23  ;;  %v1518_v60 = vsub.f32 1.0, %v1517_v59 }
 0x2c5   : > { %v1418_v30 = vpack.c.bf16 %v1414_v25, %v1414_v25  ;;  %v1412_v31 = vmul.f32 %v1949_v27, %v1352_v26 }
 0x2c6   : > { %v1417_v32 = vpack.c.bf16 %v1413_v29, %v1413_v29  ;;  %1781 = vmatmul.msk.bf16.vlgmr.msrb.gmra.mxu3 %vm1026_vm1, %v1419_v28  ;;  %v1519_v61 = vmul.f32 %v1951_v58, %v1518_v60 }
 0x2c7   : > { %v1416_v33 = vpack.c.bf16 %v1412_v31, %v1412_v31  ;;  %1780 = vmatmul.msk.bf16.vlgmr.msrb.gmra.mxu2 %vm1026_vm1, %v1418_v30  ;;  %v1410_v34 = vpop.f32.mrf.mxu3 }
 0x2c8   : > { %v1391_v35 = vpop.f32.mrf.mxu2  ;;  %1779 = vmatmul.msk.bf16.vlgmr.msrb.gmra.mxu1 %vm1026_vm1, %v1417_v32  ;;  %v1520_v62 = vadd.f32 %v1951_v58, %v1519_v61 }
 0x2c9   : > { %1778 = vmatmul.msk.bf16.vlgmr.msrb.gmra.mxu0 %vm1026_vm1, %v1416_v33  ;;  %v1372_v36 = vpop.f32.mrf.mxu1 }
 0x2ca   : > { %v1353_v37 = vpop.f32.mrf.mxu0  ;;  %v1522_v63 = vsel %vm1521_vm3, %v1951_v58, %v1520_v62 }
 0x345   : > { %v1458_v38 = vpop.f32.mrf.mxu1 }
 0x346   : > { %v1439_v39 = vpop.f32.mrf.mxu0  ;;  %v1501_v41 = vsel %vm596_vm0, %v1458_v38, 0.0 }
 0x347   : > { %v1500_v40 = vsel %vm596_vm0, %v1439_v39, 0.0 }
 0x348   : > { %v1502_v43 = vadd.f32 %v1501_v41, %v1500_v40 }
 0x349   : > { %v1496_v42 = vpop.f32.mrf.mxu3 }
 0x34a   : > { %v1477_v44 = vpop.f32.mrf.mxu2  ;;  %v1505_v48 = vsel %vm596_vm0, %v1496_v42, 0.0 }
 0x34b   : > { %v1503_v45 = vsel %vm596_vm0, %v1477_v44, 0.0 }
 0x34c   : > { %v1504_v46 = vadd.f32 %v1503_v45, %v1502_v43 }
 0x34d   : > { %v1460_v49 = vpop.f32.mrf.mxu1 }
 0x34e   : > { %v1506_v50 = vadd.f32 %v1505_v48, %v1504_v46  ;;  %v1441_v51 = vpop.f32.mrf.mxu0 }
 0x350   : > { %v1511_v52 = vadd.f32 %v1923_v47, %v1506_v50 }
 0x351   : > { %v1498_v53 = vpop.f32.mrf.mxu3 }
 0x352   : > { %v1479_v54 = vpop.f32.mrf.mxu2  ;;  %v1512_v55 = vadd.f32 %v1511_v52, %v2557_v12 }
 0x354   : > { %v1513_v56 = vsel %vm596_vm0, %v1512_v55, 0.0 }
 0x355   : > { %1514 = vadd.xlane.f32.xlu1 %v1513_v56 }
 0x3c8   : > { %v1515_v0 = vpop.xlane.xlu1 %1514 }
 0x3c9   : > { %v1523_v1 = vmul.f32 %v1522_v63, %v1515_v0 }
 0x3cb   : > { %v1524_v2 = vsub.f32 %v1512_v55, %v1523_v1 }
 0x3cd   : > { %v1525_v3 = vmul.f32 %v1524_v2, %v1524_v2 }
 0x3cf   : > { %v1526_v4 = vsel %vm596_vm0, %v1525_v3, 0.0 }
 0x3d0   : > { %1527 = vadd.xlane.f32.xlu2 %v1526_v4 }
 0x443   : > { %v1528_v12 = vpop.xlane.xlu2 %1527 }
 0x444   : > { %v1529_v5 = vmul.f32 %v1528_v12, %v1522_v63 }
 0x446   : > { %v1530_v6 = vadd.f32 1e-05, %v1529_v5 }
 0x448   : > { %1952 = vrsqrt.f32 %v1530_v6  ;;  %vm1537_vm5 = vweird.f32 %v1530_v6 }
 0x44e   : > { %v1953_v7 = vpop.eup %1952 }
 0x44f   : > { %v1532_v8 = vmul.f32 %v1953_v7, %v1530_v6  ;;  %vm1538_vm4 = vweird.f32 %v1953_v7 }
 0x450   : > { %vm1539_vm6 = vmor %vm1537_vm5, %vm1538_vm4 }
 0x451   : > { %v1533_v9 = vmul.f32 %v1953_v7, %v1532_v8 }
 0x453   : > { %v1534_v10 = vmul.f32 0.5, %v1533_v9 }
 0x455   : > { %v1535_v11 = vsub.f32 1.5, %v1534_v10 }
 0x457   : > { %v1536_v13 = vmul.f32 %v1953_v7, %v1535_v11 }
 0x459   : > { %v1540_v15 = vsel %vm1539_vm6, %v1953_v7, %v1536_v13 }
 0x45a   : > { %v1541_v16 = vmul.f32 %v1540_v15, %v1524_v2 }
 0x45c   : > { %v1546_v18 = vmul.f32 %v1924_v14, %v1541_v16 }
 0x45e   : > { %v1551_v19 = vadd.f32 %v1925_v17, %v1546_v18 }
 0x460   : > { %1552 = vst.msk [vmem:[%s568_s28] sm:$0xff] %vm596_vm0, %v1551_v19 }
 0x461   : > { %2221 = shalt.err (!%p2218_p10)
}
 0x462   : > { %1814 = dma.vmem_to_hbm [thread:$0]  (%p2467_p4), %s1567_s13, 128, %s1569_s17, %s1554_s26  }
 0x463 PF: > { %s1580_s7 = sand.u32 1, %s2268_s21   ;;  %p2764_p11 = scmp.ge.s32.totalorder %s2280_s24, 2 }
 0x464   : > { %s1581_s3 = scalar_lea.sflag [#allocation4], %s1580_s7 }
 0x465   : > { %p1843_p5 = pnand %p2764_p11, %p2471_p6 }
 0x467   : > { %p1844_p13 = pneg %p1843_p5 }
 0x469   : > { %2263 = dma.done.wait (%p1844_p13), %s1581_s3, 128  }
 0x46a   : > { %2265 = vsyncadd (%p1844_p13), %s1581_s3, 4294967168  ;;  %s2765_s24 = sld [smem:[#allocation25_spill]]  ;;  %s2768_s21 = smov %s2272_s22 }
 0x46b   : > { %s2766_s20 = sld [smem:[#allocation24_spill]] }
 0x46c   : > { %s2767_s23 = sld [smem:[#allocation26_spill]] }
 0x470   : > { %p31_p0 = scmp.ge.s32.totalorder %s2765_s24, 4  }
 0x471   : > { %s2769_s22 = smov %s2766_s20 }
 0x472   :  { %33 = sbr.rel (!%p31_p0) target bundleno = 19 (0x13), region = 150 }
 0x477   :  { %1587 = vsyncpa [#allocation3], 1 }
 0x478   :  { %1589 = vsyncpa [#allocation3 + $0x1], 1 }
 0x479   :  { %1590 = vsyncpa [#allocation6], 1 }
 0x47a   :  { %1592 = vsyncpa [#allocation6 + $0x1], 1 }
 0x47b   :  { %1593 = vsyncpa [#allocation9], 1 }
 0x47c   :  { %1594 = vsyncpa [#allocation12], 1 }
 0x47d   :  { %1595 = vsyncpa [#allocation15], 1 }
 0x47e   :  { %1596 = vsyncpa [#allocation4], 1 }
 0x47f   :  { %1598 = vsyncpa [#allocation4 + $0x1], 1 }

</bundles_post_ra>
